<compile_context>
chip_gen: v7x
topology: tpu7x:2x2x1
jax: 0.10.0
libtpu: 0.0.40
codegen_flags: <defaults>
</compile_context>

<pallas_src>
import jax
import jax.numpy as jnp
from jax.experimental import pallas as pl
from jax.experimental.pallas import tpu as pltpu

D_IN = 512
D_OUT = 1024
DROP_P = 0.1

# Name compatibility across jax versions.
_CompilerParams = getattr(pltpu, "CompilerParams", None) or getattr(
    pltpu, "TPUCompilerParams"
)


def _round_up(n, m):
    return ((n + m - 1) // m) * m


def linear_model_kernel(x_ref, mask_ref, keep_ref, w_ref, b_ref, o_ref):
    # masked sum over the sequence axis: (TB,S,D) * (TB,S,1) -> (TB,D)
    x = x_ref[...]                                   # (TB, S, D) f32
    m = mask_ref[...]                                # (TB, S)    f32
    feats = jnp.sum(x * m[:, :, None], axis=1)       # (TB, D)

    # dropout (training semantics); keep mask already scaled by 1/(1-p)
    dropped = feats * keep_ref[...]                  # (TB, D)

    # fused matmul: single (2*TB, D) @ (D, H) MXU pass for both branches
    both = jnp.concatenate([feats, dropped], axis=0)             # (2*TB, D)
    y = jnp.dot(both, w_ref[...], preferred_element_type=jnp.float32)
    y = y + b_ref[...]                                           # (2*TB, H)

    # single lane-dense store: rows [0:TB] = clean, [TB:2TB] = dropped
    tb = x.shape[0]
    o_ref[...] = y.reshape(2, tb, D_OUT).astype(o_ref.dtype)


def linear_model_forward(x, attention_mask, weight, bias, dropout_key,
                         *, training=True):
    """x: (B,S,512) f32; attention_mask: (B,S) f32; weight: (1024,512)
    (PyTorch layout); bias: (1024,); dropout_key: jax PRNG key.
    Returns (B, 2, 1024) f32 matching torch.stack((lin(f), lin(drop(f))), 1)."""
    B, S, _ = x.shape

    # batch tile: multiple of 8 (f32 sublane), capped at 128 (MXU row fill)
    tb = 128 if B >= 128 else _round_up(B, 8)
    b_pad = _round_up(B, tb)

    # pre-scaled dropout keep-mask (nn.Dropout(0.1), training mode)
    if training:
        keep = (jax.random.uniform(dropout_key, (B, D_IN)) >= DROP_P)
        keep = keep.astype(jnp.float32) * jnp.float32(1.0 / (1.0 - DROP_P))
    else:
        keep = jnp.ones((B, D_IN), jnp.float32)

    if b_pad != B:
        x = jnp.pad(x, ((0, b_pad - B), (0, 0), (0, 0)))
        attention_mask = jnp.pad(attention_mask, ((0, b_pad - B), (0, 0)))
        keep = jnp.pad(keep, ((0, b_pad - B), (0, 0)))

    w_t = weight.T                        # (512, 1024) so kernel does feats @ W
    b2d = bias.reshape(1, D_OUT)

    out = pl.pallas_call(
        linear_model_kernel,
        out_shape=jax.ShapeDtypeStruct((2, b_pad, D_OUT), jnp.float32),
        grid=(b_pad // tb,),
        in_specs=[
            pl.BlockSpec((tb, S, D_IN), lambda i: (i, 0, 0)),   # x tile
            pl.BlockSpec((tb, S), lambda i: (i, 0)),            # mask tile
            pl.BlockSpec((tb, D_IN), lambda i: (i, 0)),         # keep-mask tile
            pl.BlockSpec((D_IN, D_OUT), lambda i: (0, 0)),      # resident weight
            pl.BlockSpec((1, D_OUT), lambda i: (0, 0)),         # resident bias
        ],
        out_specs=pl.BlockSpec((2, tb, D_OUT), lambda i: (0, i, 0)),
        compiler_params=_CompilerParams(dimension_semantics=("parallel",)),
    )(x, attention_mask, keep, w_t, b2d)

    # (2, B_pad, H) -> (B, 2, H) to match torch.stack(..., dim=1)
    return jnp.transpose(out[:, :B, :], (1, 0, 2))


if __name__ == "__main__":
    key = jax.random.PRNGKey(0)
    k_x, k_m, k_w, k_b, k_drop = jax.random.split(key, 5)

    B, S = 2, 8
    x = jax.random.normal(k_x, (B, S, D_IN), dtype=jnp.float32)
    attention_mask = (jax.random.uniform(k_m, (B, S)) > 0.3).astype(jnp.float32)

    # nn.Linear(512, 1024)-style init: U(-1/sqrt(fan_in), +1/sqrt(fan_in))
    bound = 1.0 / (D_IN ** 0.5)
    weight = jax.random.uniform(k_w, (D_OUT, D_IN), minval=-bound, maxval=bound,
                                dtype=jnp.float32)
    bias = jax.random.uniform(k_b, (D_OUT,), minval=-bound, maxval=bound,
                              dtype=jnp.float32)

    out = linear_model_forward(x, attention_mask, weight, bias, k_drop)
    out = jax.block_until_ready(out)
    assert out.shape == (B, 2, D_OUT)

    # pure-JAX reference using the same dropout keep-mask
    feats = jnp.sum(x * attention_mask[:, :, None], axis=1)
    keep = (jax.random.uniform(k_drop, (B, D_IN)) >= DROP_P).astype(jnp.float32)
    keep = keep * (1.0 / (1.0 - DROP_P))
    ref = jnp.stack((feats @ weight.T + bias,
                     (feats * keep) @ weight.T + bias), axis=1)
    assert jnp.allclose(out, ref, atol=2e-3, rtol=2e-3), "mismatch vs reference"

    print("KERNEL_OK")
</pallas_src>

<mosaic_0001>
module attributes {stable_mosaic.version = 11 : i64} {
  func.func @linear_model_kernel(%arg0: i32, %arg1: memref<8x8x512xf32, #tpu.memory_space<vmem>>, %arg2: memref<8x8xf32, #tpu.memory_space<vmem>>, %arg3: memref<8x512xf32, #tpu.memory_space<vmem>>, %arg4: memref<512x1024xf32, #tpu.memory_space<vmem>>, %arg5: memref<1x1024xf32, #tpu.memory_space<vmem>>, %arg6: memref<2x8x1024xf32, #tpu.memory_space<vmem>>) attributes {dimension_semantics = [#tpu.dimension_semantics<parallel>], iteration_bounds = array<i64: 1>, scalar_prefetch = 0 : i64, scratch_operands = 0 : i64, tpu.core_type = #tpu.core_type<tc>, window_params = [{transform_indices = @transform_0, window_bounds = array<i64: 8, 8, 512>}, {transform_indices = @transform_1, window_bounds = array<i64: 8, 8>}, {transform_indices = @transform_2, window_bounds = array<i64: 8, 512>}, {pipeline_mode = #tpu.pipeline_mode<synchronous>, transform_indices = @transform_3, window_bounds = array<i64: 512, 1024>}, {pipeline_mode = #tpu.pipeline_mode<synchronous>, transform_indices = @transform_4, window_bounds = array<i64: 1, 1024>}, {transform_indices = @transform_5, window_bounds = array<i64: 2, 8, 1024>}]} {
    %c0 = arith.constant 0 : index
    %c0_0 = arith.constant 0 : index
    %c0_1 = arith.constant 0 : index
    %0 = vector.load %arg1[%c0, %c0_0, %c0_1] : memref<8x8x512xf32, #tpu.memory_space<vmem>>, vector<8x8x512xf32>
    %c0_2 = arith.constant 0 : index
    %c0_3 = arith.constant 0 : index
    %1 = vector.load %arg2[%c0_2, %c0_3] : memref<8x8xf32, #tpu.memory_space<vmem>>, vector<8x8xf32>
    %2 = vector.shape_cast %1 : vector<8x8xf32> to vector<8x8x1xf32>
    %3 = vector.broadcast %2 : vector<8x8x1xf32> to vector<8x8x512xf32>
    %4 = arith.mulf %0, %3 : vector<8x8x512xf32>
    %cst = arith.constant dense<0.000000e+00> : vector<8x512xf32>
    %5 = vector.multi_reduction <add>, %4, %cst [1] : vector<8x8x512xf32> to vector<8x512xf32>
    %c0_4 = arith.constant 0 : index
    %c0_5 = arith.constant 0 : index
    %6 = vector.load %arg3[%c0_4, %c0_5] : memref<8x512xf32, #tpu.memory_space<vmem>>, vector<8x512xf32>
    %7 = arith.mulf %5, %6 : vector<8x512xf32>
    %8 = tpu.concatenate %5, %7 in 0 : vector<8x512xf32>, vector<8x512xf32> -> vector<16x512xf32>
    %c0_6 = arith.constant 0 : index
    %c0_7 = arith.constant 0 : index
    %9 = vector.load %arg4[%c0_6, %c0_7] : memref<512x1024xf32, #tpu.memory_space<vmem>>, vector<512x1024xf32>
    %cst_8 = arith.constant dense<0.000000e+00> : vector<16x1024xf32>
    %10 = tpu.matmul %8, %9, %cst_8 {dimension_numbers = #tpu.dot_dimension_numbers<[1], [0], [0], [1], [0, 0, 1, 1], [], []>} : vector<16x512xf32>, vector<512x1024xf32>, vector<16x1024xf32> -> vector<16x1024xf32>
    %c0_9 = arith.constant 0 : index
    %c0_10 = arith.constant 0 : index
    %11 = vector.load %arg5[%c0_9, %c0_10] : memref<1x1024xf32, #tpu.memory_space<vmem>>, vector<1x1024xf32>
    %12 = vector.broadcast %11 : vector<1x1024xf32> to vector<16x1024xf32>
    %13 = arith.addf %10, %12 : vector<16x1024xf32>
    %14 = vector.shape_cast %13 : vector<16x1024xf32> to vector<2x8x1024xf32>
    %c0_11 = arith.constant 0 : index
    %c0_12 = arith.constant 0 : index
    %c0_13 = arith.constant 0 : index
    %15 = vector.load %arg6[%c0_11, %c0_12, %c0_13] : memref<2x8x1024xf32, #tpu.memory_space<vmem>>, vector<2x8x1024xf32>
    tpu.vector_store %arg6[%c0_11, %c0_12, %c0_13], %14 {strides = array<i32>} : memref<2x8x1024xf32, #tpu.memory_space<vmem>>, vector<2x8x1024xf32>,
    return
  }
  func.func @transform_0(%arg0: i32) -> (i32, i32, i32) {
    %c0_i32 = arith.constant 0 : i32
    %c0_i32_0 = arith.constant 0 : i32
    %c0_i32_1 = arith.constant 0 : i32
    return %arg0, %c0_i32, %c0_i32_0 : i32, i32, i32
  }
  func.func @transform_1(%arg0: i32) -> (i32, i32) {
    %c0_i32 = arith.constant 0 : i32
    %c0_i32_0 = arith.constant 0 : i32
    return %arg0, %c0_i32 : i32, i32
  }
  func.func @transform_2(%arg0: i32) -> (i32, i32) {
    %c0_i32 = arith.constant 0 : i32
    %c0_i32_0 = arith.constant 0 : i32
    return %arg0, %c0_i32 : i32, i32
  }
  func.func @transform_3(%arg0: i32) -> (i32, i32) {
    %c0_i32 = arith.constant 0 : i32
    %c0_i32_0 = arith.constant 0 : i32
    %c0_i32_1 = arith.constant 0 : i32
    return %c0_i32, %c0_i32_0 : i32, i32
  }
  func.func @transform_4(%arg0: i32) -> (i32, i32) {
    %c0_i32 = arith.constant 0 : i32
    %c0_i32_0 = arith.constant 0 : i32
    %c0_i32_1 = arith.constant 0 : i32
    return %c0_i32, %c0_i32_0 : i32, i32
  }
  func.func @transform_5(%arg0: i32) -> (i32, i32, i32) {
    %c0_i32 = arith.constant 0 : i32
    %c0_i32_0 = arith.constant 0 : i32
    %c0_i32_1 = arith.constant 0 : i32
    return %c0_i32, %arg0, %c0_i32_0 : i32, i32, i32
  }
}

</mosaic_0001>

<bundles_post_ra>
// kernel: tpu_custom_call.1
= control target key start
LH: loop header
LB: loop body
LE: loop exit
PB: predicated region body
PF: predicated region fallthrough
CT: control target
= control target key end

     0   :  { %10 = vsyncpa [#allocation3], 0  ;;  %s3319_s0 = inlined_call_operand.hbm [shape: f32[8,8,512], index: 0, kind: input, shape index: {}]   ;;  %s3320_s1 = inlined_call_operand.hbm [shape: f32[8,8], index: 1, kind: input, shape index: {}]   ;;  %s3321_s2 = inlined_call_operand.hbm [shape: f32[8,512], index: 2, kind: input, shape index: {}]   ;;  %s3322_s3 = inlined_call_operand.hbm [shape: f32[512,1024], index: 3, kind: input, shape index: {}]   ;;  %s3323_s4 = inlined_call_operand.hbm [shape: f32[1,1024], index: 4, kind: input, shape index: {}]   ;;  %s3324_s5 = inlined_call_operand.hbm [shape: f32[2,8,1024], index: 5, kind: output, shape index: {}]  }
   0x1   :  { %11 = vsyncpa [#allocation6], 0 }
   0x2   :  { %12 = vsyncpa [#allocation9], 0 }
   0x3   :  { %13 = vsyncpa [#allocation4], 0  ;;  %s2558_s18 = smov [#allocation5]   ;;  %s2559_s20 = smov [#allocation8]  }
   0x4   :  { %s32_s19 = sshll.u32 %s2558_s18, 4  ;;  %s51_s21 = sshll.u32 %s2559_s20, 4  ;;  %s33_s19 = int_to_ptr.vmem [resolvable:$true] %s32_s19  ;;  %s2598_s21 = int_to_ptr.vmem [resolvable:$true] %s51_s21 }
   0x5   :  { %s2418_s24 = scalar_lea.hbm %s3320_s1, 128 }
   0x6   :  { %p2419_p0 = scmp.ne.s32.totalorder %s3320_s1, %s2418_s24  ;;  %p2422_p1 = scmp.lt.u32.totalorder %s2418_s24, %s3320_s1 }
   0x8   :  { %p2424_p2 = pnand %p2422_p1, %p2419_p0 }
   0xa   :  { %2427 = shalt.err (!%p2424_p2)
}
   0xb   :  { %s2428_s29 = scalar_lea.vmem %s33_s19, 128  ;;  %p2433_p4 = scmp.lt.s32.totalorder %s33_s19, %s33_s19 }
   0xc   :  { %p2429_p3 = scmp.ne.s32.totalorder %s33_s19, %s2428_s29  ;;  %p2434_p5 = scmp.lt.s32.totalorder %s2428_s29, %s2428_s29 }
   0xe   :  { %p2435_p6 = por %p2434_p5, %p2433_p4 }
  0x10   :  { %p2436_p7 = pnand %p2435_p6, %p2429_p3 }
  0x12   :  { %2439 = shalt.err (!%p2436_p7)
}
  0x13   :  { %35 = dma.hbm_to_vmem [thread:$0]  %s3320_s1, 128, %s33_s19, [#allocation6]  }
  0x14   :  { %s2440_s9 = scalar_lea.hbm %s3322_s3, 65536 }
  0x15   :  { %p2441_p8 = scmp.ne.s32.totalorder %s3322_s3, %s2440_s9  ;;  %p2444_p9 = scmp.lt.u32.totalorder %s2440_s9, %s3322_s3 }
  0x17   :  { %p2446_p10 = pnand %p2444_p9, %p2441_p8 }
  0x19   :  { %2449 = shalt.err (!%p2446_p10)
}
  0x1a   :  { %s2450_s14 = scalar_lea.vmem %s2598_s21, 65536  ;;  %p2455_p12 = scmp.lt.s32.totalorder %s2598_s21, %s2598_s21 }
  0x1b   :  { %p2451_p11 = scmp.ne.s32.totalorder %s2598_s21, %s2450_s14  ;;  %p2456_p13 = scmp.lt.s32.totalorder %s2450_s14, %s2450_s14 }
  0x1d   :  { %p2457_p0 = por %p2456_p13, %p2455_p12 }
  0x1f   :  { %p2458_p1 = pnand %p2457_p0, %p2451_p11 }
  0x21   :  { %2461 = shalt.err (!%p2458_p1)
}
  0x22   :  { %s2560_s1 = smov 1024   ;;  %s2561_s15 = smov 64  }
  0x23   :  { %57 = dma.hbm_to_vmem [thread:$0]  %s3322_s3, 65536, %s2598_s21, [#allocation9], %s2560_s1, %s2560_s1, %s2561_s15  }
  0x24   :  { %s2562_s18 = smov [#allocation2]   ;;  %s2462_s23 = scalar_lea.hbm %s3319_s0, 4096 }
  0x25   :  { %s19_s19 = sshll.u32 %s2562_s18, 4  ;;  %p2463_p2 = scmp.ne.s32.totalorder %s3319_s0, %s2462_s23  ;;  %s20_s19 = int_to_ptr.vmem [resolvable:$true] %s19_s19 }
  0x26   :  { %p2466_p3 = scmp.lt.u32.totalorder %s2462_s23, %s3319_s0 }
  0x28   :  { %p2468_p4 = pnand %p2466_p3, %p2463_p2 }
  0x2a   :  { %2471 = shalt.err (!%p2468_p4)
}
  0x2b   :  { %s2472_s28 = scalar_lea.vmem %s20_s19, 4096  ;;  %p2477_p6 = scmp.lt.s32.totalorder %s20_s19, %s20_s19 }
  0x2c   :  { %p2473_p5 = scmp.ne.s32.totalorder %s20_s19, %s2472_s28  ;;  %p2478_p7 = scmp.lt.s32.totalorder %s2472_s28, %s2472_s28 }
  0x2e   :  { %p2479_p8 = por %p2478_p7, %p2477_p6 }
  0x30   :  { %p2480_p9 = pnand %p2479_p8, %p2473_p5 }
  0x32   :  { %2483 = shalt.err (!%p2480_p9)
}
  0x33   :  { %s2563_s3 = smov 512   ;;  %s2564_s21 = smov 32  }
  0x34   :  { %25 = dma.hbm_to_vmem [thread:$0]  %s3319_s0, 4096, %s20_s19, [#allocation3], %s2563_s3, %s2563_s3, %s2564_s21  }
  0x35   :  { %s2565_s6 = smov [#allocation7]   ;;  %s2566_s8 = smov [#allocation10]  }
  0x36   :  { %s42_s7 = sshll.u32 %s2565_s6, 4  ;;  %s64_s9 = sshll.u32 %s2566_s8, 4  ;;  %s43_s7 = int_to_ptr.vmem [resolvable:$true] %s42_s7  ;;  %s65_s9 = int_to_ptr.vmem [resolvable:$true] %s64_s9 }
  0x37   :  { %s2484_s12 = scalar_lea.hbm %s3321_s2, 512 }
  0x38   :  { %p2485_p10 = scmp.ne.s32.totalorder %s3321_s2, %s2484_s12  ;;  %p2488_p11 = scmp.lt.u32.totalorder %s2484_s12, %s3321_s2 }
  0x3a   :  { %p2490_p12 = pnand %p2488_p11, %p2485_p10 }
  0x3c   :  { %2493 = shalt.err (!%p2490_p12)
}
  0x3d   :  { %s2494_s0 = scalar_lea.vmem %s43_s7, 512  ;;  %p2499_p0 = scmp.lt.s32.totalorder %s43_s7, %s43_s7 }
  0x3e   :  { %p2495_p13 = scmp.ne.s32.totalorder %s43_s7, %s2494_s0  ;;  %p2500_p1 = scmp.lt.s32.totalorder %s2494_s0, %s2494_s0 }
  0x40   :  { %p2501_p2 = por %p2500_p1, %p2499_p0 }
  0x42   :  { %p2502_p3 = pnand %p2501_p2, %p2495_p13 }
  0x44   :  { %2505 = shalt.err (!%p2502_p3)
}
  0x45   :  { %45 = dma.hbm_to_vmem [thread:$0]  %s3321_s2, 512, %s43_s7, [#allocation6]  }
  0x46   :  { %s2506_s23 = scalar_lea.hbm %s3323_s4, 128 }
  0x47   :  { %p2507_p4 = scmp.ne.s32.totalorder %s3323_s4, %s2506_s23  ;;  %p2510_p5 = scmp.lt.u32.totalorder %s2506_s23, %s3323_s4 }
  0x49   :  { %p2512_p6 = pnand %p2510_p5, %p2507_p4 }
  0x4b   :  { %2515 = shalt.err (!%p2512_p6)
}
  0x4c   :  { %s2516_s28 = scalar_lea.vmem %s65_s9, 128  ;;  %p2521_p8 = scmp.lt.s32.totalorder %s65_s9, %s65_s9 }
  0x4d   :  { %p2517_p7 = scmp.ne.s32.totalorder %s65_s9, %s2516_s28  ;;  %p2522_p9 = scmp.lt.s32.totalorder %s2516_s28, %s2516_s28 }
  0x4f   :  { %p2523_p10 = por %p2522_p9, %p2521_p8 }
  0x51   :  { %p2524_p11 = pnand %p2523_p10, %p2517_p7 }
  0x53   :  { %2527 = shalt.err (!%p2524_p11)
}
  0x54   :  { %67 = dma.hbm_to_vmem [thread:$0]  %s3323_s4, 128, %s65_s9, [#allocation9]  }
  0x55   :  { %2550 = dma.done.wait [#allocation3], 4096  }
  0x56   :  { %2551 = vsyncadd [#allocation3], 4294963200 }
  0x57   :  { %2552 = dma.done.wait [#allocation6], 640  }
  0x58   :  { %2553 = vsyncadd [#allocation6], 4294966656 }
  0x59   :  { %2554 = dma.done.wait [#allocation9], 65664  }
  0x5a   :  { %2555 = vsyncadd [#allocation9], 4294901632  ;;  %v116_v0 = vlaneseq  ;;  %v2674_v6 = vld [vmem:[#allocation5] sm:$0xff]  ;;  %v660_v7 = vld [vmem:[#allocation8 + $0x8] sm:$0xff]  ;;  %vm528_vm0 = vcmask 1041409   ;;  %vm530_vm1 = vcmask 1042434  }
  0x5b   :  { %v668_v8 = vld [vmem:[#allocation8 + $0x48] sm:$0xff]  ;;  %v662_v11 = vld [vmem:[#allocation8 + $0x18] sm:$0xff]  ;;  %v659_v13 = vld [vmem:[#allocation8] sm:$0xff]  ;;  %vm532_vm2 = vcmask 1043459   ;;  %vm534_vm3 = vcmask 1044484   ;;  %vm536_vm4 = vcmask 1045509  }
  0x5c   :  { %v2668_v1 = vshrl.u32 %v116_v0, 7  ;;  %v670_v12 = vld [vmem:[#allocation8 + $0x58] sm:$0xff]  ;;  %v667_v17 = vld [vmem:[#allocation8 + $0x40] sm:$0xff]  ;;  %v661_v18 = vld [vmem:[#allocation8 + $0x10] sm:$0xff]  ;;  %v1864_v21 = vpack.c.bf16 %v668_v8, %v660_v7  ;;  %vm538_vm5 = vcmask 1046534   ;;  %vm540_vm6 = vcmask 1047559  }
  0x5d   :  { %v669_v19 = vld [vmem:[#allocation8 + $0x50] sm:$0xff]  ;;  %v1992_v22 = vpack.c.bf16 %v670_v12, %v662_v11  ;;  %v1866_v23 = vpack.c.bf16 %v667_v17, %v659_v13  ;;  %v676_v24 = vld [vmem:[#allocation8 + $0x88] sm:$0xff]  ;;  %v678_v26 = vld [vmem:[#allocation8 + $0x98] sm:$0xff]  ;;  %s2567_s4 = smov [#allocation11]  }
  0x5e   :  { %3378 = vst [vmem:[#allocation16_spill] sm:$0xff] %v2668_v1  ;;  %v3331_v2 = vsub.s32 2, %v2668_v1  ;;  %v3332_v3 = vsub.s32 0, %v2668_v1  ;;  %v3329_v4 = vsub.s32 3, %v2668_v1  ;;  %v3330_v5 = vsub.s32 1, %v2668_v1  ;;  %v684_v25 = vld [vmem:[#allocation8 + $0xc8] sm:$0xff]  ;;  %1865 = vmatprep.subr.bf16.mxu0 %v1864_v21 }
  0x5f   :  { %v3326_v16 = vsub.s32 5, %v2668_v1  ;;  %v3328_v20 = vsub.s32 4, %v2668_v1  ;;  %v1994_v27 = vpack.c.bf16 %v669_v19, %v661_v18  ;;  %v1868_v28 = vpack.c.bf16 %v684_v25, %v676_v24  ;;  %v686_v29 = vld [vmem:[#allocation8 + $0xd8] sm:$0xff]  ;;  %v675_v30 = vld [vmem:[#allocation8 + $0x80] sm:$0xff]  ;;  %1993 = vmatprep.subr.bf16.mxu1 %v1992_v22  ;;  %v677_v33 = vld [vmem:[#allocation8 + $0x90] sm:$0xff]  ;;  %1867 = vmatpush1.bf16.msra.mxu0 %v1866_v23  ;;  %s1850_s21 = sshll.u32 %s2567_s4, 4  ;;  %s1851_s21 = int_to_ptr.vmem [resolvable:$true] %s1850_s21 }
  0x60   :  { %v133_v9 = vrot.slane %v2674_v6, %v3331_v2  ;;  %v119_v10 = vrot.slane %v2674_v6, %v3332_v3  ;;  %v140_v14 = vrot.slane %v2674_v6, %v3329_v4  ;;  %v126_v15 = vrot.slane %v2674_v6, %v3330_v5  ;;  %v683_v31 = vld [vmem:[#allocation8 + $0xc0] sm:$0xff]  ;;  %v685_v34 = vld [vmem:[#allocation8 + $0xd0] sm:$0xff]  ;;  %v692_v35 = vld [vmem:[#allocation8 + $0x108] sm:$0xff]  ;;  %s2528_s29 = scalar_lea.vmem %s1851_s21, 2048  ;;  %p2533_p13 = scmp.lt.s32.totalorder %s1851_s21, %s1851_s21 }
  0x61   :  { %v1996_v32 = vpack.c.bf16 %v686_v29, %v678_v26  ;;  %v3325_v36 = vsub.s32 7, %v2668_v1  ;;  %1995 = vmatpush1.bf16.msra.mxu1 %v1994_v27  ;;  %v1870_v37 = vpack.c.bf16 %v683_v31, %v675_v30  ;;  %v1998_v38 = vpack.c.bf16 %v685_v34, %v677_v33  ;;  %v700_v39 = vld [vmem:[#allocation8 + $0x148] sm:$0xff]  ;;  %v694_v40 = vld [vmem:[#allocation8 + $0x118] sm:$0xff]  ;;  %v691_v45 = vld [vmem:[#allocation8 + $0x100] sm:$0xff]  ;;  %1869 = vmatprep.subr.bf16.mxu0 %v1868_v28  ;;  %p2529_p12 = scmp.ne.s32.totalorder %s1851_s21, %s2528_s29  ;;  %p2534_p0 = scmp.lt.s32.totalorder %s2528_s29, %s2528_s29 }
  0x62   :  { %135 = vbcast.lane.b32.xlu1 %v133_v9, 256  ;;  %121 = vbcast.lane.b32.xlu0 %v119_v10, 256  ;;  %v702_v41 = vld [vmem:[#allocation8 + $0x158] sm:$0xff]  ;;  %v154_v42 = vrot.slane %v2674_v6, %v3326_v16  ;;  %v147_v43 = vrot.slane %v2674_v6, %v3328_v20  ;;  %v3327_v44 = vsub.s32 6, %v2668_v1  ;;  %v699_v46 = vld [vmem:[#allocation8 + $0x140] sm:$0xff]  ;;  %v693_v47 = vld [vmem:[#allocation8 + $0x110] sm:$0xff]  ;;  %v1872_v48 = vpack.c.bf16 %v700_v39, %v692_v35 }
  0x63   :  { %1997 = vmatprep.subr.bf16.mxu1 %v1996_v32  ;;  %v2000_v49 = vpack.c.bf16 %v702_v41, %v694_v40  ;;  %v701_v50 = vld [vmem:[#allocation8 + $0x150] sm:$0xff]  ;;  %v708_v51 = vld [vmem:[#allocation8 + $0x188] sm:$0xff]  ;;  %v710_v53 = vld [vmem:[#allocation8 + $0x198] sm:$0xff]  ;;  %1871 = vmatpush1.bf16.msra.mxu0 %v1870_v37  ;;  %v1874_v55 = vpack.c.bf16 %v699_v46, %v691_v45  ;;  %v168_v59 = vrot.slane %v2674_v6, %v3325_v36  ;;  %p2535_p1 = por %p2534_p0, %p2533_p13 }
  0x64   :  { %v716_v52 = vld [vmem:[#allocation8 + $0x1c8] sm:$0xff]  ;;  %v718_v54 = vld [vmem:[#allocation8 + $0x1d8] sm:$0xff]  ;;  %v2002_v56 = vpack.c.bf16 %v701_v50, %v693_v47  ;;  %v707_v57 = vld [vmem:[#allocation8 + $0x180] sm:$0xff]  ;;  %v161_v60 = vrot.slane %v2674_v6, %v3327_v44  ;;  %1873 = vmatprep.subr.bf16.mxu0 %v1872_v48 }
  0x65   :  { %1999 = vmatpush1.bf16.msra.mxu1 %v1998_v38  ;;  %v715_v58 = vld [vmem:[#allocation8 + $0x1c0] sm:$0xff]  ;;  %v709_v61 = vld [vmem:[#allocation8 + $0x190] sm:$0xff]  ;;  %v724_v63 = vld [vmem:[#allocation8 + $0x208] sm:$0xff]  ;;  %v1876_v0 = vpack.c.bf16 %v716_v52, %v708_v51  ;;  %v2004_v7 = vpack.c.bf16 %v718_v54, %v710_v53  ;;  %p2536_p2 = pnand %p2535_p1, %p2529_p12 }
  0x66   :  { %142 = vbcast.lane.b32.xlu1 %v140_v14, 256  ;;  %128 = vbcast.lane.b32.xlu0 %v126_v15, 256  ;;  %v717_v62 = vld [vmem:[#allocation8 + $0x1d0] sm:$0xff]  ;;  %v732_v8 = vld [vmem:[#allocation8 + $0x248] sm:$0xff]  ;;  %v726_v9 = vld [vmem:[#allocation8 + $0x218] sm:$0xff]  ;;  %v1878_v11 = vpack.c.bf16 %v715_v58, %v707_v57 }
  0x67   :  { %2001 = vmatprep.subr.bf16.mxu1 %v2000_v49  ;;  %v734_v10 = vld [vmem:[#allocation8 + $0x258] sm:$0xff]  ;;  %1875 = vmatpush1.bf16.msra.mxu0 %v1874_v55  ;;  %v2006_v12 = vpack.c.bf16 %v717_v62, %v709_v61  ;;  %v723_v13 = vld [vmem:[#allocation8 + $0x200] sm:$0xff]  ;;  %v1880_v15 = vpack.c.bf16 %v732_v8, %v724_v63  ;;  %v725_v17 = vld [vmem:[#allocation8 + $0x210] sm:$0xff] }
  0x68   :  { %v731_v14 = vld [vmem:[#allocation8 + $0x240] sm:$0xff]  ;;  %v2008_v6 = vpack.c.bf16 %v734_v10, %v726_v9  ;;  %v733_v18 = vld [vmem:[#allocation8 + $0x250] sm:$0xff]  ;;  %v740_v19 = vld [vmem:[#allocation8 + $0x288] sm:$0xff]  ;;  %1877 = vmatprep.subr.bf16.mxu0 %v1876_v0 }
  0x69   :  { %2003 = vmatpush1.bf16.msra.mxu1 %v2002_v56  ;;  %v748_v21 = vld [vmem:[#allocation8 + $0x2c8] sm:$0xff]  ;;  %v742_v22 = vld [vmem:[#allocation8 + $0x298] sm:$0xff]  ;;  %v1882_v24 = vpack.c.bf16 %v731_v14, %v723_v13  ;;  %v2010_v25 = vpack.c.bf16 %v733_v18, %v725_v17  ;;  %v739_v26 = vld [vmem:[#allocation8 + $0x280] sm:$0xff] }
  0x6a   :  { %156 = vbcast.lane.b32.xlu1 %v154_v42, 256  ;;  %149 = vbcast.lane.b32.xlu0 %v147_v43, 256  ;;  %v750_v23 = vld [vmem:[#allocation8 + $0x2d8] sm:$0xff]  ;;  %v747_v27 = vld [vmem:[#allocation8 + $0x2c0] sm:$0xff]  ;;  %v1884_v28 = vpack.c.bf16 %v748_v21, %v740_v19  ;;  %v741_v30 = vld [vmem:[#allocation8 + $0x290] sm:$0xff] }
  0x6b   :  { %2005 = vmatprep.subr.bf16.mxu1 %v2004_v7  ;;  %1879 = vmatpush1.bf16.msra.mxu0 %v1878_v11  ;;  %v2012_v29 = vpack.c.bf16 %v750_v23, %v742_v22  ;;  %v749_v31 = vld [vmem:[#allocation8 + $0x2d0] sm:$0xff]  ;;  %v756_v32 = vld [vmem:[#allocation8 + $0x308] sm:$0xff]  ;;  %v758_v34 = vld [vmem:[#allocation8 + $0x318] sm:$0xff]  ;;  %v1886_v37 = vpack.c.bf16 %v747_v27, %v739_v26 }
  0x6c   :  { %1881 = vmatprep.subr.bf16.mxu0 %v1880_v15  ;;  %v764_v33 = vld [vmem:[#allocation8 + $0x348] sm:$0xff]  ;;  %v766_v35 = vld [vmem:[#allocation8 + $0x358] sm:$0xff]  ;;  %v2014_v38 = vpack.c.bf16 %v749_v31, %v741_v30  ;;  %v755_v39 = vld [vmem:[#allocation8 + $0x300] sm:$0xff] }
  0x6d   :  { %2007 = vmatpush1.bf16.msra.mxu1 %v2006_v12  ;;  %v763_v40 = vld [vmem:[#allocation8 + $0x340] sm:$0xff]  ;;  %v1888_v41 = vpack.c.bf16 %v764_v33, %v756_v32  ;;  %v2016_v42 = vpack.c.bf16 %v766_v35, %v758_v34  ;;  %v757_v43 = vld [vmem:[#allocation8 + $0x310] sm:$0xff]  ;;  %v772_v46 = vld [vmem:[#allocation8 + $0x388] sm:$0xff] }
  0x6e   :  { %170 = vbcast.lane.b32.xlu1 %v168_v59, 256  ;;  %163 = vbcast.lane.b32.xlu0 %v161_v60, 256  ;;  %v765_v45 = vld [vmem:[#allocation8 + $0x350] sm:$0xff]  ;;  %v780_v47 = vld [vmem:[#allocation8 + $0x3c8] sm:$0xff]  ;;  %v774_v48 = vld [vmem:[#allocation8 + $0x398] sm:$0xff]  ;;  %v1890_v50 = vpack.c.bf16 %v763_v40, %v755_v39 }
  0x6f   :  { %2009 = vmatprep.subr.bf16.mxu1 %v2008_v6  ;;  %1883 = vmatpush1.bf16.msra.mxu0 %v1882_v24  ;;  %v782_v49 = vld [vmem:[#allocation8 + $0x3d8] sm:$0xff]  ;;  %v2018_v51 = vpack.c.bf16 %v765_v45, %v757_v43  ;;  %v771_v52 = vld [vmem:[#allocation8 + $0x380] sm:$0xff]  ;;  %v1892_v54 = vpack.c.bf16 %v780_v47, %v772_v46  ;;  %v773_v56 = vld [vmem:[#allocation8 + $0x390] sm:$0xff] }
  0x70   :  { %1885 = vmatprep.subr.bf16.mxu0 %v1884_v28  ;;  %v779_v53 = vld [vmem:[#allocation8 + $0x3c0] sm:$0xff]  ;;  %v2020_v55 = vpack.c.bf16 %v782_v49, %v774_v48  ;;  %v781_v57 = vld [vmem:[#allocation8 + $0x3d0] sm:$0xff]  ;;  %v788_v58 = vld [vmem:[#allocation8 + $0x408] sm:$0xff] }
  0x71   :  { %2011 = vmatpush1.bf16.msra.mxu1 %v2010_v25  ;;  %v796_v59 = vld [vmem:[#allocation8 + $0x448] sm:$0xff]  ;;  %v790_v60 = vld [vmem:[#allocation8 + $0x418] sm:$0xff]  ;;  %v1894_v62 = vpack.c.bf16 %v779_v53, %v771_v52  ;;  %v2022_v63 = vpack.c.bf16 %v781_v57, %v773_v56  ;;  %v787_v0 = vld [vmem:[#allocation8 + $0x400] sm:$0xff] }
  0x72   :  { %2013 = vmatprep.subr.bf16.mxu1 %v2012_v29  ;;  %v798_v61 = vld [vmem:[#allocation8 + $0x458] sm:$0xff]  ;;  %v795_v7 = vld [vmem:[#allocation8 + $0x440] sm:$0xff]  ;;  %v1896_v8 = vpack.c.bf16 %v796_v59, %v788_v58  ;;  %v789_v10 = vld [vmem:[#allocation8 + $0x410] sm:$0xff] }
  0x73   :  { %1887 = vmatpush1.bf16.msra.mxu0 %v1886_v37  ;;  %v2024_v9 = vpack.c.bf16 %v798_v61, %v790_v60  ;;  %v797_v11 = vld [vmem:[#allocation8 + $0x450] sm:$0xff]  ;;  %v804_v12 = vld [vmem:[#allocation8 + $0x488] sm:$0xff]  ;;  %v806_v14 = vld [vmem:[#allocation8 + $0x498] sm:$0xff]  ;;  %v1898_v6 = vpack.c.bf16 %v795_v7, %v787_v0 }
  0x74   :  { %1889 = vmatprep.subr.bf16.mxu0 %v1888_v41  ;;  %v812_v13 = vld [vmem:[#allocation8 + $0x4c8] sm:$0xff]  ;;  %v814_v15 = vld [vmem:[#allocation8 + $0x4d8] sm:$0xff]  ;;  %v2026_v17 = vpack.c.bf16 %v797_v11, %v789_v10  ;;  %v803_v18 = vld [vmem:[#allocation8 + $0x480] sm:$0xff] }
  0x75   :  { %2015 = vmatpush1.bf16.msra.mxu1 %v2014_v38  ;;  %v811_v19 = vld [vmem:[#allocation8 + $0x4c0] sm:$0xff]  ;;  %v1900_v21 = vpack.c.bf16 %v812_v13, %v804_v12  ;;  %v2028_v22 = vpack.c.bf16 %v814_v15, %v806_v14  ;;  %v805_v23 = vld [vmem:[#allocation8 + $0x490] sm:$0xff]  ;;  %v820_v25 = vld [vmem:[#allocation8 + $0x508] sm:$0xff] }
  0x76   :  { %2017 = vmatprep.subr.bf16.mxu1 %v2016_v42  ;;  %v813_v24 = vld [vmem:[#allocation8 + $0x4d0] sm:$0xff]  ;;  %v828_v26 = vld [vmem:[#allocation8 + $0x548] sm:$0xff]  ;;  %v822_v27 = vld [vmem:[#allocation8 + $0x518] sm:$0xff]  ;;  %v1902_v29 = vpack.c.bf16 %v811_v19, %v803_v18 }
  0x77   :  { %1891 = vmatpush1.bf16.msra.mxu0 %v1890_v50  ;;  %v830_v28 = vld [vmem:[#allocation8 + $0x558] sm:$0xff]  ;;  %v2030_v30 = vpack.c.bf16 %v813_v24, %v805_v23  ;;  %v819_v31 = vld [vmem:[#allocation8 + $0x500] sm:$0xff]  ;;  %v1904_v33 = vpack.c.bf16 %v828_v26, %v820_v25  ;;  %v821_v35 = vld [vmem:[#allocation8 + $0x510] sm:$0xff] }
  0x78   :  { %1893 = vmatprep.subr.bf16.mxu0 %v1892_v54  ;;  %v827_v32 = vld [vmem:[#allocation8 + $0x540] sm:$0xff]  ;;  %v2032_v34 = vpack.c.bf16 %v830_v28, %v822_v27  ;;  %v829_v37 = vld [vmem:[#allocation8 + $0x550] sm:$0xff]  ;;  %v836_v38 = vld [vmem:[#allocation8 + $0x588] sm:$0xff] }
  0x79   :  { %2019 = vmatpush1.bf16.msra.mxu1 %v2018_v51  ;;  %v844_v39 = vld [vmem:[#allocation8 + $0x5c8] sm:$0xff]  ;;  %v838_v40 = vld [vmem:[#allocation8 + $0x598] sm:$0xff]  ;;  %v1906_v42 = vpack.c.bf16 %v827_v32, %v819_v31  ;;  %v2034_v43 = vpack.c.bf16 %v829_v37, %v821_v35  ;;  %v835_v45 = vld [vmem:[#allocation8 + $0x580] sm:$0xff] }
  0x7a   :  { %2021 = vmatprep.subr.bf16.mxu1 %v2020_v55  ;;  %v846_v41 = vld [vmem:[#allocation8 + $0x5d8] sm:$0xff]  ;;  %v1908_v46 = vpack.c.bf16 %v844_v39, %v836_v38  ;;  %v843_v48 = vld [vmem:[#allocation8 + $0x5c0] sm:$0xff]  ;;  %v837_v49 = vld [vmem:[#allocation8 + $0x590] sm:$0xff] }
  0x7b   :  { %1895 = vmatpush1.bf16.msra.mxu0 %v1894_v62  ;;  %v2036_v47 = vpack.c.bf16 %v846_v41, %v838_v40  ;;  %v845_v50 = vld [vmem:[#allocation8 + $0x5d0] sm:$0xff]  ;;  %v852_v51 = vld [vmem:[#allocation8 + $0x608] sm:$0xff]  ;;  %v854_v53 = vld [vmem:[#allocation8 + $0x618] sm:$0xff]  ;;  %v1910_v55 = vpack.c.bf16 %v843_v48, %v835_v45 }
  0x7c   :  { %1897 = vmatprep.subr.bf16.mxu0 %v1896_v8  ;;  %v860_v52 = vld [vmem:[#allocation8 + $0x648] sm:$0xff]  ;;  %v862_v54 = vld [vmem:[#allocation8 + $0x658] sm:$0xff]  ;;  %v2038_v56 = vpack.c.bf16 %v845_v50, %v837_v49  ;;  %v851_v57 = vld [vmem:[#allocation8 + $0x600] sm:$0xff] }
  0x7d   :  { %2023 = vmatpush1.bf16.msra.mxu1 %v2022_v63  ;;  %v859_v58 = vld [vmem:[#allocation8 + $0x640] sm:$0xff]  ;;  %v1912_v59 = vpack.c.bf16 %v860_v52, %v852_v51  ;;  %v2040_v60 = vpack.c.bf16 %v862_v54, %v854_v53  ;;  %v853_v61 = vld [vmem:[#allocation8 + $0x610] sm:$0xff]  ;;  %v868_v63 = vld [vmem:[#allocation8 + $0x688] sm:$0xff] }
  0x7e   :  { %2025 = vmatprep.subr.bf16.mxu1 %v2024_v9  ;;  %v861_v62 = vld [vmem:[#allocation8 + $0x650] sm:$0xff]  ;;  %v876_v0 = vld [vmem:[#allocation8 + $0x6c8] sm:$0xff]  ;;  %v870_v7 = vld [vmem:[#allocation8 + $0x698] sm:$0xff]  ;;  %v1914_v9 = vpack.c.bf16 %v859_v58, %v851_v57 }
  0x7f   :  { %1899 = vmatpush1.bf16.msra.mxu0 %v1898_v6  ;;  %v878_v8 = vld [vmem:[#allocation8 + $0x6d8] sm:$0xff]  ;;  %v2042_v10 = vpack.c.bf16 %v861_v62, %v853_v61  ;;  %v867_v11 = vld [vmem:[#allocation8 + $0x680] sm:$0xff]  ;;  %v1916_v13 = vpack.c.bf16 %v876_v0, %v868_v63  ;;  %v869_v15 = vld [vmem:[#allocation8 + $0x690] sm:$0xff] }
  0x80   :  { %1901 = vmatprep.subr.bf16.mxu0 %v1900_v21  ;;  %v875_v12 = vld [vmem:[#allocation8 + $0x6c0] sm:$0xff]  ;;  %v2044_v14 = vpack.c.bf16 %v878_v8, %v870_v7  ;;  %v877_v6 = vld [vmem:[#allocation8 + $0x6d0] sm:$0xff]  ;;  %v892_v18 = vld [vmem:[#allocation8 + $0x748] sm:$0xff] }
  0x81   :  { %2027 = vmatpush1.bf16.msra.mxu1 %v2026_v17  ;;  %v884_v17 = vld [vmem:[#allocation8 + $0x708] sm:$0xff]  ;;  %v886_v19 = vld [vmem:[#allocation8 + $0x718] sm:$0xff]  ;;  %v2046_v23 = vpack.c.bf16 %v877_v6, %v869_v15  ;;  %v883_v24 = vld [vmem:[#allocation8 + $0x700] sm:$0xff] }
  0x82   :  { %2029 = vmatprep.subr.bf16.mxu1 %v2028_v22  ;;  %v894_v21 = vld [vmem:[#allocation8 + $0x758] sm:$0xff]  ;;  %v1918_v22 = vpack.c.bf16 %v875_v12, %v867_v11  ;;  %v891_v25 = vld [vmem:[#allocation8 + $0x740] sm:$0xff]  ;;  %v1920_v26 = vpack.c.bf16 %v892_v18, %v884_v17  ;;  %v885_v28 = vld [vmem:[#allocation8 + $0x710] sm:$0xff] }
  0x83   :  { %1903 = vmatpush1.bf16.msra.mxu0 %v1902_v29  ;;  %v2048_v27 = vpack.c.bf16 %v894_v21, %v886_v19  ;;  %v893_v29 = vld [vmem:[#allocation8 + $0x750] sm:$0xff]  ;;  %v908_v31 = vld [vmem:[#allocation8 + $0x7c8] sm:$0xff]  ;;  %v902_v32 = vld [vmem:[#allocation8 + $0x798] sm:$0xff] }
  0x84   :  { %1905 = vmatprep.subr.bf16.mxu0 %v1904_v33  ;;  %v910_v33 = vld [vmem:[#allocation8 + $0x7d8] sm:$0xff]  ;;  %v2050_v35 = vpack.c.bf16 %v893_v29, %v885_v28  ;;  %v899_v37 = vld [vmem:[#allocation8 + $0x780] sm:$0xff]  ;;  %v901_v41 = vld [vmem:[#allocation8 + $0x790] sm:$0xff] }
  0x85   :  { %2031 = vmatpush1.bf16.msra.mxu1 %v2030_v30  ;;  %v900_v30 = vld [vmem:[#allocation8 + $0x788] sm:$0xff]  ;;  %v2052_v39 = vpack.c.bf16 %v910_v33, %v902_v32  ;;  %v907_v40 = vld [vmem:[#allocation8 + $0x7c0] sm:$0xff]  ;;  %v2708_v54 = vld [vmem:[#allocation7 + $0x10] sm:$0xff] }
  0x86   :  { %2033 = vmatprep.subr.bf16.mxu1 %v2032_v34  ;;  %v1922_v34 = vpack.c.bf16 %v891_v25, %v883_v24  ;;  %v1924_v38 = vpack.c.bf16 %v908_v31, %v900_v30  ;;  %v924_v45 = vld [vmem:[#allocation8 + $0x848] sm:$0xff]  ;;  %v1926_v48 = vpack.c.bf16 %v907_v40, %v899_v37  ;;  %v2704_v52 = vld [vmem:[#allocation7] sm:$0xff]  ;;  %3379 = vst [vmem:[#allocation17_spill] sm:$0xff] %v2708_v54  ;;  %v91_v6 = vld [vmem:[#allocation2 + $0x40] sm:$0xff] }
  0x87   :  { %1907 = vmatpush1.bf16.msra.mxu0 %v1906_v42  ;;  %v909_v42 = vld [vmem:[#allocation8 + $0x7d0] sm:$0xff]  ;;  %v2706_v53 = vld [vmem:[#allocation7 + $0x8] sm:$0xff]  ;;  %v2721_v7 = vld [vmem:[#allocation8 + $0x800] sm:$0xff] }
  0x88   :  { %1909 = vmatprep.subr.bf16.mxu0 %v1908_v46  ;;  %v918_v46 = vld [vmem:[#allocation8 + $0x818] sm:$0xff]  ;;  %v2054_v49 = vpack.c.bf16 %v909_v42, %v901_v41  ;;  %v2723_v8 = vld [vmem:[#allocation8 + $0x840] sm:$0xff]  ;;  %v2734_v15 = vld [vmem:[#allocation8 + $0x8c8] sm:$0xff] }
  0x89   :  { %2035 = vmatpush1.bf16.msra.mxu1 %v2034_v43  ;;  %v916_v43 = vld [vmem:[#allocation8 + $0x808] sm:$0xff]  ;;  %v92_v17 = vld [vmem:[#allocation2 + $0x48] sm:$0xff]  ;;  %v2741_v24 = vld [vmem:[#allocation8 + $0x8d8] sm:$0xff] }
  0x8a   :  { %2037 = vmatprep.subr.bf16.mxu1 %v2036_v47  ;;  %v926_v47 = vld [vmem:[#allocation8 + $0x858] sm:$0xff]  ;;  %v1928_v50 = vpack.c.bf16 %v924_v45, %v916_v43  ;;  %v93_v18 = vld [vmem:[#allocation2 + $0x50] sm:$0xff]  ;;  %v2743_v25 = vld [vmem:[#allocation8 + $0x880] sm:$0xff] }
  0x8b   :  { %1911 = vmatpush1.bf16.msra.mxu0 %v1910_v55  ;;  %v2056_v51 = vpack.c.bf16 %v926_v47, %v918_v46  ;;  %v2710_v55 = vld [vmem:[#allocation7 + $0x18] sm:$0xff]  ;;  %3381 = vst [vmem:[#allocation19_spill] sm:$0xff] %v2743_v25  ;;  %v2748_v29 = vld [vmem:[#allocation8 + $0x8c0] sm:$0xff]  ;;  %v2750_v30 = vld [vmem:[#allocation8 + $0x890] sm:$0xff] }
  0x8c   :  { %1913 = vmatprep.subr.bf16.mxu0 %v1912_v59  ;;  %3380 = vst [vmem:[#allocation18_spill] sm:$0xff] %v2710_v55  ;;  %3382 = vst [vmem:[#allocation20_spill] sm:$0xff] %v2748_v29  ;;  %v2752_v31 = vld [vmem:[#allocation8 + $0x8d0] sm:$0xff]  ;;  %v83_v33 = vld [vmem:[#allocation2] sm:$0xff]  ;;  %v3432_v29 = vrot.slane %v2704_v52, 1 }
  0x8d   :  { %2039 = vmatpush1.bf16.msra.mxu1 %v2038_v56  ;;  %3383 = vst [vmem:[#allocation21_spill] sm:$0xff] %v2750_v30  ;;  %3384 = vst [vmem:[#allocation22_spill] sm:$0xff] %v2752_v31  ;;  %v94_v32 = vld [vmem:[#allocation2 + $0x58] sm:$0xff]  ;;  %v85_v40 = vld [vmem:[#allocation2 + $0x10] sm:$0xff] }
  0x8e   :  { %2041 = vmatprep.subr.bf16.mxu1 %v2040_v60  ;;  %v86_v41 = vld [vmem:[#allocation2 + $0x18] sm:$0xff]  ;;  %v2780_v36 = vld [vmem:[#allocation8 + $0x900] sm:$0xff]  ;;  %v2806_v19 = vld [vmem:[#allocation8 + $0xa08] sm:$0xff] }
  0x8f   :  { %1915 = vmatpush1.bf16.msra.mxu0 %v1914_v9  ;;  %v2725_v9 = vld [vmem:[#allocation8 + $0x810] sm:$0xff]  ;;  %3389 = vst [vmem:[#allocation27_spill] sm:$0xff] %v2780_v36  ;;  %v2782_v37 = vld [vmem:[#allocation8 + $0x940] sm:$0xff]  ;;  %3401 = vst [vmem:[#allocation39_spill] sm:$0xff] %v2806_v19 }
  0x90   :  { %1917 = vmatprep.subr.bf16.mxu0 %v1916_v13  ;;  %v2730_v13 = vld [vmem:[#allocation8 + $0x850] sm:$0xff]  ;;  %3390 = vst [vmem:[#allocation28_spill] sm:$0xff] %v2782_v37  ;;  %v2808_v12 = vld [vmem:[#allocation8 + $0xa48] sm:$0xff]  ;;  %v2824_v0 = vld [vmem:[#allocation8 + $0xa40] sm:$0xff] }
  0x91   :  { %2043 = vmatpush1.bf16.msra.mxu1 %v2042_v10  ;;  %v2784_v28 = vld [vmem:[#allocation8 + $0x910] sm:$0xff]  ;;  %3402 = vst [vmem:[#allocation40_spill] sm:$0xff] %v2808_v12  ;;  %v2810_v10 = vld [vmem:[#allocation8 + $0xa18] sm:$0xff]  ;;  %3406 = vst [vmem:[#allocation44_spill] sm:$0xff] %v2824_v0 }
  0x92   :  { %2045 = vmatprep.subr.bf16.mxu1 %v2044_v14  ;;  %v2732_v14 = vld [vmem:[#allocation8 + $0x888] sm:$0xff]  ;;  %3391 = vst [vmem:[#allocation29_spill] sm:$0xff] %v2784_v28  ;;  %v2804_v21 = vld [vmem:[#allocation8 + $0x9d0] sm:$0xff]  ;;  %3403 = vst [vmem:[#allocation41_spill] sm:$0xff] %v2810_v10 }
  0x93   :  { %1919 = vmatpush1.bf16.msra.mxu0 %v1918_v22  ;;  %3400 = vst [vmem:[#allocation38_spill] sm:$0xff] %v2804_v21  ;;  %v2828_v62 = vld [vmem:[#allocation8 + $0xa10] sm:$0xff]  ;;  %v2845_v63 = vld [vmem:[#allocation8 + $0xac8] sm:$0xff]  ;;  %v2847_v56 = vld [vmem:[#allocation8 + $0xa98] sm:$0xff] }
  0x94   :  { %1921 = vmatprep.subr.bf16.mxu0 %v1920_v26  ;;  %3407 = vst [vmem:[#allocation45_spill] sm:$0xff] %v2828_v62  ;;  %3410 = vst [vmem:[#allocation48_spill] sm:$0xff] %v2845_v63  ;;  %v2849_v1 = vld [vmem:[#allocation8 + $0xad8] sm:$0xff]  ;;  %v89_v12 = vld [vmem:[#allocation2 + $0x30] sm:$0xff] }
  0x95   :  { %2047 = vmatpush1.bf16.msra.mxu1 %v2046_v23  ;;  %v2739_v23 = vld [vmem:[#allocation8 + $0x898] sm:$0xff]  ;;  %3411 = vst [vmem:[#allocation49_spill] sm:$0xff] %v2847_v56  ;;  %3412 = vst [vmem:[#allocation50_spill] sm:$0xff] %v2849_v1 }
  0x96   :  { %2049 = vmatprep.subr.bf16.mxu1 %v2048_v27  ;;  %v2802_v27 = vld [vmem:[#allocation8 + $0x990] sm:$0xff] }
  0x97   :  { %1923 = vmatpush1.bf16.msra.mxu0 %v1922_v34  ;;  %3399 = vst [vmem:[#allocation37_spill] sm:$0xff] %v2802_v27 }
  0x98   :  { %1925 = vmatprep.subr.bf16.mxu0 %v1924_v38  ;;  %v2772_v38 = vld [vmem:[#allocation8 + $0x908] sm:$0xff] }
  0x99   :  { %2051 = vmatpush1.bf16.msra.mxu1 %v2050_v35  ;;  %3385 = vst [vmem:[#allocation23_spill] sm:$0xff] %v2772_v38 }
  0x9a   :  { %2053 = vmatprep.subr.bf16.mxu1 %v2052_v39  ;;  %v84_v39 = vld [vmem:[#allocation2 + $0x8] sm:$0xff] }
  0x9b   :  { %1927 = vmatpush1.bf16.msra.mxu0 %v1926_v48 }
  0x9c   :  { %1929 = vmatprep.subr.bf16.mxu0 %v1928_v50 }
  0x9d   :  { %2055 = vmatpush1.bf16.msra.mxu1 %v2054_v49 }
  0x9e   :  { %2057 = vmatprep.subr.bf16.mxu1 %v2056_v51  ;;  %v2774_v51 = vld [vmem:[#allocation8 + $0x948] sm:$0xff] }
  0x9f   :  { %3386 = vst [vmem:[#allocation24_spill] sm:$0xff] %v2774_v51 }
  0xd4   :  { %v136_v47 = vpop.permute.xlu1 %135  ;;  %v122_v48 = vpop.permute.xlu0 %121 }
  0xd5   :  { %v180_v16 = vmul.f32 %v136_v47, %v91_v6  ;;  %v181_v44 = vmul.f32 %v136_v47, %v92_v17  ;;  %v182_v20 = vmul.f32 %v136_v47, %v93_v18  ;;  %v183_v4 = vmul.f32 %v136_v47, %v94_v32 }
  0xd6   :  { %v172_v5 = vmul.f32 %v122_v48, %v83_v33  ;;  %v173_v2 = vmul.f32 %v122_v48, %v84_v39  ;;  %v174_v3 = vmul.f32 %v122_v48, %v85_v40  ;;  %v175_v22 = vmul.f32 %v122_v48, %v86_v41  ;;  %v2776_v33 = vld [vmem:[#allocation8 + $0x918] sm:$0xff] }
  0xd7   :  { %v252_v26 = vrot.slane %v180_v16, 4  ;;  %v258_v11 = vrot.slane %v181_v44, 4  ;;  %v264_v46 = vrot.slane %v182_v20, 4  ;;  %v270_v45 = vrot.slane %v183_v4, 4  ;;  %3387 = vst [vmem:[#allocation25_spill] sm:$0xff] %v2776_v33  ;;  %v2778_v39 = vld [vmem:[#allocation8 + $0x958] sm:$0xff] }
  0xd8   :  { %v204_v49 = vrot.slane %v172_v5, 4  ;;  %v210_v43 = vrot.slane %v173_v2, 4  ;;  %v216_v42 = vrot.slane %v174_v3, 4  ;;  %v222_v50 = vrot.slane %v175_v22, 4  ;;  %3388 = vst [vmem:[#allocation26_spill] sm:$0xff] %v2778_v39  ;;  %v129_v19 = vpop.permute.xlu0 %128 }
  0xd9   :  { %v253_v6 = vadd.f32 %v252_v26, %v180_v16  ;;  %v259_v17 = vadd.f32 %v258_v11, %v181_v44  ;;  %v265_v18 = vadd.f32 %v264_v46, %v182_v20  ;;  %v271_v32 = vadd.f32 %v270_v45, %v183_v4  ;;  %v2788_v20 = vld [vmem:[#allocation8 + $0x950] sm:$0xff]  ;;  %v2790_v44 = vld [vmem:[#allocation8 + $0x988] sm:$0xff]  ;;  %v2794_v26 = vld [vmem:[#allocation8 + $0x998] sm:$0xff] }
  0xda   :  { %v205_v40 = vadd.f32 %v204_v49, %v172_v5  ;;  %v211_v41 = vadd.f32 %v210_v43, %v173_v2  ;;  %v217_v47 = vadd.f32 %v216_v42, %v174_v3  ;;  %v223_v48 = vadd.f32 %v222_v50, %v175_v22  ;;  %3392 = vst [vmem:[#allocation30_spill] sm:$0xff] %v2788_v20  ;;  %v2792_v5 = vld [vmem:[#allocation8 + $0x9c8] sm:$0xff]  ;;  %v2796_v42 = vld [vmem:[#allocation8 + $0x9d8] sm:$0xff]  ;;  %v2798_v50 = vld [vmem:[#allocation8 + $0x980] sm:$0xff] }
  0xdb   :  { %v254_v34 = vrot.slane %v253_v6, 2  ;;  %v260_v35 = vrot.slane %v259_v17, 2  ;;  %v266_v16 = vrot.slane %v265_v18, 2  ;;  %3393 = vst [vmem:[#allocation31_spill] sm:$0xff] %v2790_v44  ;;  %3394 = vst [vmem:[#allocation32_spill] sm:$0xff] %v2792_v5  ;;  %v272_v2 = vrot.slane %v271_v32, 2 }
  0xdc   :  { %v206_v3 = vrot.slane %v205_v40, 2  ;;  %v212_v11 = vrot.slane %v211_v41, 2  ;;  %v218_v22 = vrot.slane %v217_v47, 2  ;;  %3395 = vst [vmem:[#allocation33_spill] sm:$0xff] %v2794_v26  ;;  %3396 = vst [vmem:[#allocation34_spill] sm:$0xff] %v2796_v42  ;;  %v224_v49 = vrot.slane %v223_v48, 2 }
  0xdd   :  { %v255_v43 = vadd.f32 %v254_v34, %v253_v6  ;;  %v261_v45 = vadd.f32 %v260_v35, %v259_v17  ;;  %v267_v46 = vadd.f32 %v266_v16, %v265_v18  ;;  %3397 = vst [vmem:[#allocation35_spill] sm:$0xff] %v2798_v50  ;;  %v2800_v4 = vld [vmem:[#allocation8 + $0x9c0] sm:$0xff]  ;;  %v2820_v18 = vld [vmem:[#allocation8 + $0xa58] sm:$0xff]  ;;  %v2830_v34 = vld [vmem:[#allocation8 + $0xa50] sm:$0xff]  ;;  %v2837_v60 = vadd.f32 %v272_v2, %v271_v32 }
  0xde   :  { %3398 = vst [vmem:[#allocation36_spill] sm:$0xff] %v2800_v4  ;;  %3404 = vst [vmem:[#allocation42_spill] sm:$0xff] %v2820_v18  ;;  %v2822_v16 = vld [vmem:[#allocation8 + $0xa00] sm:$0xff]  ;;  %v2832_v35 = vld [vmem:[#allocation8 + $0xa88] sm:$0xff]  ;;  %v2839_v59 = vadd.f32 %v206_v3, %v205_v40  ;;  %v2841_v58 = vadd.f32 %v212_v11, %v211_v41  ;;  %v2843_v57 = vadd.f32 %v218_v22, %v217_v47  ;;  %v143_v11 = vpop.permute.xlu1 %142 }
  0xdf   :  { %3405 = vst [vmem:[#allocation43_spill] sm:$0xff] %v2822_v16  ;;  %3408 = vst [vmem:[#allocation46_spill] sm:$0xff] %v2830_v34  ;;  %v256_v26 = vrot.slane %v255_v43, 1  ;;  %v262_v6 = vrot.slane %v261_v45, 1  ;;  %v268_v42 = vrot.slane %v267_v46, 1  ;;  %v2851_v61 = vadd.f32 %v224_v49, %v223_v48  ;;  %v95_v17 = vld [vmem:[#allocation2 + $0x60] sm:$0xff] }
  0xe0   :  { %3409 = vst [vmem:[#allocation47_spill] sm:$0xff] %v2832_v35  ;;  %v96_v32 = vld [vmem:[#allocation2 + $0x68] sm:$0xff]  ;;  %v97_v2 = vld [vmem:[#allocation2 + $0x70] sm:$0xff]  ;;  %v98_v22 = vld [vmem:[#allocation2 + $0x78] sm:$0xff]  ;;  %v274_v47 = vrot.slane %v2837_v60, 1  ;;  %v208_v3 = vrot.slane %v2839_v59, 1  ;;  %v184_v41 = vmul.f32 %v143_v11, %v95_v17  ;;  %v178_v0 = vmul.f32 %v129_v19, %v89_v12 }
  0xe1   :  { %v87_v44 = vld [vmem:[#allocation2 + $0x20] sm:$0xff]  ;;  %v88_v48 = vld [vmem:[#allocation2 + $0x28] sm:$0xff]  ;;  %v214_v10 = vrot.slane %v2841_v58, 1  ;;  %v220_v18 = vrot.slane %v2843_v57, 1  ;;  %v90_v49 = vld [vmem:[#allocation2 + $0x38] sm:$0xff]  ;;  %v2873_v16 = vadd.f32 %v256_v26, %v255_v43  ;;  %v2875_v5 = vadd.f32 %v262_v6, %v261_v45 }
  0xe2   :  { %v2877_v62 = vadd.f32 %v268_v42, %v267_v46  ;;  %v226_v40 = vrot.slane %v2851_v61, 1  ;;  %v185_v56 = vmul.f32 %v143_v11, %v96_v32  ;;  %v186_v1 = vmul.f32 %v143_v11, %v97_v2 }
  0xe3   :  { %v187_v35 = vmul.f32 %v143_v11, %v98_v22  ;;  %v176_v63 = vmul.f32 %v129_v19, %v87_v44  ;;  %v177_v34 = vmul.f32 %v129_v19, %v88_v48  ;;  %v179_v27 = vmul.f32 %v129_v19, %v90_v49 }
  0xe4   :  { %3413 = vst [vmem:[#allocation51_spill] sm:$0xff] %v2877_v62  ;;  %v276_v21 = vrot.slane %v184_v41, 4  ;;  %v282_v50 = vrot.slane %v185_v56, 4  ;;  %v288_v4 = vrot.slane %v186_v1, 4  ;;  %v240_v45 = vrot.slane %v178_v0, 4 }
  0xe5   :  { %v294_v28 = vrot.slane %v187_v35, 4  ;;  %v228_v26 = vrot.slane %v176_v63, 4  ;;  %v234_v43 = vrot.slane %v177_v34, 4  ;;  %v246_v6 = vrot.slane %v179_v27, 4 }
  0xe6   :  { %v277_v42 = vadd.f32 %v276_v21, %v184_v41  ;;  %v283_v46 = vadd.f32 %v282_v50, %v185_v56  ;;  %v289_v20 = vadd.f32 %v288_v4, %v186_v1  ;;  %v241_v2 = vadd.f32 %v240_v45, %v178_v0 }
  0xe7   :  { %v295_v36 = vadd.f32 %v294_v28, %v187_v35  ;;  %v229_v17 = vadd.f32 %v228_v26, %v176_v63  ;;  %v235_v32 = vadd.f32 %v234_v43, %v177_v34  ;;  %v247_v11 = vadd.f32 %v246_v6, %v179_v27 }
  0xe8   :  { %v278_v44 = vrot.slane %v277_v42, 2  ;;  %v284_v22 = vrot.slane %v283_v46, 2  ;;  %v290_v12 = vrot.slane %v289_v20, 2  ;;  %v242_v37 = vrot.slane %v241_v2, 2 }
  0xe9   :  { %v296_v19 = vrot.slane %v295_v36, 2  ;;  %v230_v48 = vrot.slane %v229_v17, 2  ;;  %v236_v49 = vrot.slane %v235_v32, 2  ;;  %v248_v33 = vrot.slane %v247_v11, 2 }
  0xea   :  { %v279_v39 = vadd.f32 %v278_v44, %v277_v42  ;;  %v285_v38 = vadd.f32 %v284_v22, %v283_v46  ;;  %v291_v51 = vadd.f32 %v290_v12, %v289_v20  ;;  %v243_v28 = vadd.f32 %v242_v37, %v241_v2  ;;  %v157_v44 = vpop.permute.xlu1 %156  ;;  %v105_v22 = vld [vmem:[#allocation2 + $0xb0] sm:$0xff]  ;;  %v106_v12 = vld [vmem:[#allocation2 + $0xb8] sm:$0xff] }
  0xeb   :  { %v297_v21 = vadd.f32 %v296_v19, %v295_v36  ;;  %v231_v56 = vadd.f32 %v230_v48, %v229_v17  ;;  %v237_v1 = vadd.f32 %v236_v49, %v235_v32  ;;  %v249_v63 = vadd.f32 %v248_v33, %v247_v11  ;;  %v99_v19 = vld [vmem:[#allocation2 + $0x80] sm:$0xff] }
  0xec   :  { %v280_v4 = vrot.slane %v279_v39, 1  ;;  %v286_v0 = vrot.slane %v285_v38, 1  ;;  %v292_v27 = vrot.slane %v291_v51, 1  ;;  %v2881_v34 = vadd.f32 %v274_v47, %v2837_v60 }
  0xed   :  { %v298_v50 = vrot.slane %v297_v21, 1  ;;  %v2884_v35 = vadd.f32 %v208_v3, %v2839_v59  ;;  %v2887_v41 = vadd.f32 %v214_v10, %v2841_v58  ;;  %v244_v26 = vrot.slane %v243_v28, 1 }
  0xee   :  { %v3414_v36 = vrot.slane %v2704_v52, 2  ;;  %v3415_v37 = vrot.slane %v2706_v53, 2  ;;  %v221_v60 = vadd.f32 %v220_v18, %v2843_v57  ;;  %v2901_v47 = vadd.f32 %v226_v40, %v2851_v61  ;;  %v104_v40 = vld [vmem:[#allocation2 + $0xa8] sm:$0xff] }
  0xef   :  { %v232_v59 = vrot.slane %v231_v56, 1  ;;  %v238_v3 = vrot.slane %v237_v1, 1  ;;  %v2903_v58 = vadd.f32 %v244_v26, %v243_v28  ;;  %v250_v10 = vrot.slane %v249_v63, 1 }
  0xf0   :  { %v2892_v20 = vmul.f32 %v3414_v36, %v2873_v16  ;;  %v2897_v33 = vmul.f32 %v3415_v37, %v2875_v5  ;;  %v2905_v43 = vadd.f32 %v280_v4, %v279_v39  ;;  %v2907_v45 = vadd.f32 %v286_v0, %v285_v38  ;;  %v150_v4 = vpop.permute.xlu0 %149  ;;  %v100_v0 = vld [vmem:[#allocation2 + $0x88] sm:$0xff] }
  0xf1   :  { %3416 = vst [vmem:[#allocation52_spill] sm:$0xff] %v2903_v58  ;;  %v2909_v6 = vadd.f32 %v292_v27, %v291_v51  ;;  %v2911_v42 = vadd.f32 %v298_v50, %v297_v21  ;;  %v3419_v46 = vrot.slane %v2708_v54, 2  ;;  %v3421_v61 = vrot.slane %v2710_v55, 2  ;;  %v103_v51 = vld [vmem:[#allocation2 + $0xa0] sm:$0xff]  ;;  %v101_v27 = vld [vmem:[#allocation2 + $0x90] sm:$0xff]  ;;  %v102_v50 = vld [vmem:[#allocation2 + $0x98] sm:$0xff] }
  0xf2   :  { %v2925_v39 = vmul.f32 %v2704_v52, %v2884_v35  ;;  %v2929_v38 = vmul.f32 %v2706_v53, %v2887_v41  ;;  %v2934_v2 = vmul.f32 %v2708_v54, %v221_v60  ;;  %v2938_v11 = vmul.f32 %v2710_v55, %v2901_v47 }
  0xf3   :  { %3417 = vst [vmem:[#allocation53_spill] sm:$0xff] %v2909_v6  ;;  %3418 = vst [vmem:[#allocation54_spill] sm:$0xff] %v2911_v42  ;;  %v2916_v57 = vmul.f32 %v3419_v46, %v2877_v62  ;;  %v2921_v18 = vmul.f32 %v3421_v61, %v2881_v34  ;;  %v233_v48 = vadd.f32 %v232_v59, %v231_v56  ;;  %v3426_v26 = vrot.slane %v2704_v52, 3 }
  0xf4   :  { %3423 = vst [vmem:[#allocation57_spill] sm:$0xff] %v2934_v2  ;;  %3424 = vst [vmem:[#allocation58_spill] sm:$0xff] %v2938_v11  ;;  %v2940_v49 = vadd.f32 %v238_v3, %v237_v1  ;;  %v2942_v21 = vadd.f32 %v250_v10, %v249_v63  ;;  %v2946_v28 = vsel %vm528_vm0, %v2903_v58, %v221_v60  ;;  %v3427_v56 = vrot.slane %v2706_v53, 3 }
  0xf5   :  { %3420 = vst [vmem:[#allocation55_spill] sm:$0xff] %v2916_v57  ;;  %3422 = vst [vmem:[#allocation56_spill] sm:$0xff] %v2921_v18  ;;  %v2951_v36 = vmul.f32 %v3426_v26, %v2905_v43  ;;  %v3428_v63 = vrot.slane %v2708_v54, 3  ;;  %v3430_v60 = vrot.slane %v2710_v55, 3  ;;  %v192_v3 = vmul.f32 %v157_v44, %v103_v51 }
  0xf6   :  { %3425 = vst [vmem:[#allocation59_spill] sm:$0xff] %v2946_v28  ;;  %v2956_v1 = vmul.f32 %v3427_v56, %v2907_v45  ;;  %v193_v10 = vmul.f32 %v157_v44, %v104_v40  ;;  %v194_v46 = vmul.f32 %v157_v44, %v105_v22  ;;  %v195_v61 = vmul.f32 %v157_v44, %v106_v12 }
  0xf7   :  { %v2961_v37 = vmul.f32 %v3428_v63, %v2909_v6  ;;  %v2966_v59 = vmul.f32 %v3430_v60, %v2911_v42  ;;  %v188_v26 = vmul.f32 %v150_v4, %v99_v19  ;;  %v189_v17 = vmul.f32 %v150_v4, %v100_v0 }
  0xf8   :  { %v190_v32 = vmul.f32 %v150_v4, %v101_v27  ;;  %v191_v2 = vmul.f32 %v150_v4, %v102_v50  ;;  %v324_v56 = vrot.slane %v192_v3, 4  ;;  %v330_v57 = vrot.slane %v193_v10, 4 }
  0xf9   :  { %3429 = vst [vmem:[#allocation60_spill] sm:$0xff] %v2961_v37  ;;  %3431 = vst [vmem:[#allocation61_spill] sm:$0xff] %v2966_v59  ;;  %v336_v11 = vrot.slane %v194_v46, 4  ;;  %v342_v62 = vrot.slane %v195_v61, 4  ;;  %v300_v28 = vrot.slane %v188_v26, 4  ;;  %v306_v63 = vrot.slane %v189_v17, 4 }
  0xfa   :  { %v312_v37 = vrot.slane %v190_v32, 4  ;;  %v318_v6 = vrot.slane %v191_v2, 4  ;;  %v325_v18 = vadd.f32 %v324_v56, %v192_v3  ;;  %v331_v30 = vadd.f32 %v330_v57, %v193_v10  ;;  %v112_v56 = vld [vmem:[#allocation2 + $0xe8] sm:$0xff] }
  0xfb   :  { %v337_v60 = vadd.f32 %v336_v11, %v194_v46  ;;  %v343_v59 = vadd.f32 %v342_v62, %v195_v61  ;;  %v301_v51 = vadd.f32 %v300_v28, %v188_v26  ;;  %v307_v40 = vadd.f32 %v306_v63, %v189_v17  ;;  %v111_v61 = vld [vmem:[#allocation2 + $0xe0] sm:$0xff]  ;;  %v113_v63 = vld [vmem:[#allocation2 + $0xf0] sm:$0xff] }
  0xfc   :  { %v313_v22 = vadd.f32 %v312_v37, %v190_v32  ;;  %v319_v44 = vadd.f32 %v318_v6, %v191_v2  ;;  %v326_v12 = vrot.slane %v325_v18, 2  ;;  %v332_v19 = vrot.slane %v331_v30, 2 }
  0xfd   :  { %v338_v0 = vrot.slane %v337_v60, 2  ;;  %v344_v4 = vrot.slane %v343_v59, 2  ;;  %v302_v27 = vrot.slane %v301_v51, 2  ;;  %v308_v50 = vrot.slane %v307_v40, 2 }
  0xfe   :  { %v314_v31 = vrot.slane %v313_v22, 2  ;;  %v320_v25 = vrot.slane %v319_v44, 2  ;;  %v2970_v54 = vmul.f32 %v3432_v29, %v233_v48  ;;  %v3433_v57 = vrot.slane %v2706_v53, 1 }
  0xff   :  { %v327_v17 = vadd.f32 %v326_v12, %v325_v18  ;;  %v333_v32 = vadd.f32 %v332_v19, %v331_v30  ;;  %v345_v6 = vadd.f32 %v344_v4, %v343_v59  ;;  %v303_v2 = vadd.f32 %v302_v27, %v301_v51  ;;  %v114_v51 = vld [vmem:[#allocation2 + $0xf8] sm:$0xff] }
 0x100   :  { %v2975_v62 = vmul.f32 %v3433_v57, %v2940_v49  ;;  %v309_v11 = vadd.f32 %v308_v50, %v307_v40  ;;  %v315_v28 = vadd.f32 %v314_v31, %v313_v22  ;;  %v3434_v10 = vrot.slane %v2710_v55, 1  ;;  %v171_v31 = vpop.permute.xlu1 %170  ;;  %v108_v57 = vld [vmem:[#allocation2 + $0xc8] sm:$0xff] }
 0x101   :  { %v2986_v46 = vsel %vm528_vm0, %v233_v48, %v2884_v35  ;;  %v328_v18 = vrot.slane %v327_v17, 1  ;;  %v2988_v30 = vadd.f32 %v338_v0, %v337_v60  ;;  %v304_v59 = vrot.slane %v303_v2, 1  ;;  %v164_v60 = vpop.permute.xlu0 %163 }
 0x102   :  { %v2982_v29 = vmul.f32 %v3434_v10, %v2942_v21  ;;  %v2990_v26 = vadd.f32 %v320_v25, %v319_v44  ;;  %v2995_v40 = vsel %vm528_vm0, %v2940_v49, %v2887_v41  ;;  %v3000_v35 = vsel %vm528_vm0, %v2942_v21, %v2901_v47  ;;  %v107_v21 = vld [vmem:[#allocation2 + $0xc0] sm:$0xff] }
 0x103   :  { %3436 = vst [vmem:[#allocation63_spill] sm:$0xff] %v2988_v30  ;;  %v334_v25 = vrot.slane %v333_v32, 1  ;;  %v346_v22 = vrot.slane %v345_v6, 1  ;;  %v310_v44 = vrot.slane %v309_v11, 1  ;;  %v316_v12 = vrot.slane %v315_v28, 1 }
 0x104   :  { %3435 = vst [vmem:[#allocation62_spill] sm:$0xff] %v2982_v29  ;;  %v200_v19 = vmul.f32 %v171_v31, %v111_v61  ;;  %v201_v0 = vmul.f32 %v171_v31, %v112_v56  ;;  %v202_v4 = vmul.f32 %v171_v31, %v113_v63  ;;  %v203_v27 = vmul.f32 %v171_v31, %v114_v51  ;;  %v109_v61 = vld [vmem:[#allocation2 + $0xd0] sm:$0xff]  ;;  %v110_v56 = vld [vmem:[#allocation2 + $0xd8] sm:$0xff] }
 0x105   :  { %v3004_v50 = vadd.f32 %v328_v18, %v327_v17  ;;  %v3007_v49 = vadd.f32 %v304_v59, %v303_v2  ;;  %v322_v47 = vrot.slane %v2990_v26, 1  ;;  %v3010_v63 = vadd.f32 %v334_v25, %v333_v32 }
 0x106   :  { %v372_v10 = vrot.slane %v200_v19, 4  ;;  %v378_v37 = vrot.slane %v201_v0, 4  ;;  %v384_v48 = vrot.slane %v202_v4, 4  ;;  %v390_v3 = vrot.slane %v203_v27, 4 }
 0x107   :  { %v3012_v17 = vadd.f32 %v346_v22, %v345_v6  ;;  %v311_v18 = vadd.f32 %v310_v44, %v309_v11  ;;  %v3014_v31 = vadd.f32 %v316_v12, %v315_v28  ;;  %v196_v30 = vmul.f32 %v164_v60, %v107_v21 }
 0x108   :  { %v373_v2 = vadd.f32 %v372_v10, %v200_v19  ;;  %v379_v59 = vadd.f32 %v378_v37, %v201_v0  ;;  %v385_v51 = vadd.f32 %v384_v48, %v202_v4  ;;  %v391_v41 = vadd.f32 %v390_v3, %v203_v27 }
 0x109   :  { %3437 = vst [vmem:[#allocation64_spill] sm:$0xff] %v3014_v31  ;;  %v197_v29 = vmul.f32 %v164_v60, %v108_v57  ;;  %v198_v55 = vmul.f32 %v164_v60, %v109_v61  ;;  %v199_v58 = vmul.f32 %v164_v60, %v110_v56  ;;  %v3438_v42 = vrot.slane %v2704_v52, 4 }
 0x10a   :  { %v374_v6 = vrot.slane %v373_v2, 2  ;;  %v380_v25 = vrot.slane %v379_v59, 2  ;;  %v392_v11 = vrot.slane %v391_v41, 2  ;;  %v348_v28 = vrot.slane %v196_v30, 4 }
 0x10b   :  { %v3019_v32 = vmul.f32 %v3438_v42, %v3007_v49  ;;  %v354_v22 = vrot.slane %v197_v29, 4  ;;  %v360_v44 = vrot.slane %v198_v55, 4  ;;  %v366_v12 = vrot.slane %v199_v58, 4 }
 0x10c   :  { %v3439_v37 = vrot.slane %v2706_v53, 4  ;;  %v375_v48 = vadd.f32 %v374_v6, %v373_v2  ;;  %v381_v19 = vadd.f32 %v380_v25, %v379_v59  ;;  %v386_v60 = vrot.slane %v385_v51, 2 }
 0x10d   :  { %v349_v0 = vadd.f32 %v348_v28, %v196_v30  ;;  %v355_v4 = vadd.f32 %v354_v22, %v197_v29  ;;  %v361_v27 = vadd.f32 %v360_v44, %v198_v55  ;;  %v367_v42 = vadd.f32 %v366_v12, %v199_v58 }
 0x10e   :  { %v481_v3 = vmul.f32 %v3439_v37, %v311_v18  ;;  %v3024_v21 = vadd.f32 %v322_v47, %v2990_v26  ;;  %v605_v57 = vrot.slane %v3019_v32, 4  ;;  %v382_v10 = vrot.slane %v381_v19, 1  ;;  %v3460_v32 = vld [vmem:[#allocation18_spill] sm:$0xff] }
 0x10f   :  { %v3027_v61 = vadd.f32 %v392_v11, %v391_v41  ;;  %v376_v56 = vrot.slane %v375_v48, 1  ;;  %v350_v31 = vrot.slane %v349_v0, 2  ;;  %v356_v37 = vrot.slane %v355_v4, 2 }
 0x110   :  { %v368_v2 = vrot.slane %v367_v42, 2  ;;  %v619_v59 = vrot.slane %v481_v3, 4  ;;  %v362_v6 = vrot.slane %v361_v27, 2  ;;  %v383_v25 = vadd.f32 %v382_v10, %v381_v19 }
 0x111   :  { %v543_v55 = vsel %vm530_vm1, %v2875_v5, %v2995_v40  ;;  %v3032_v58 = vadd.f32 %v386_v60, %v385_v51  ;;  %v351_v29 = vadd.f32 %v350_v31, %v349_v0  ;;  %v357_v30 = vadd.f32 %v356_v37, %v355_v4 }
 0x112   :  { %v369_v26 = vadd.f32 %v368_v2, %v367_v42  ;;  %v544_v41 = vsel %vm532_vm2, %v2907_v45, %v543_v55  ;;  %v531_v47 = vsel %vm530_vm1, %v2873_v16, %v2986_v46  ;;  %v3440_v11 = vrot.slane %v2706_v53, 5 }
 0x113   :  { %v3441_v22 = vrot.slane %v2706_v53, 7  ;;  %v394_v5 = vrot.slane %v3027_v61, 1  ;;  %v352_v40 = vrot.slane %v351_v29, 1  ;;  %v358_v31 = vrot.slane %v357_v30, 1 }
 0x114   :  { %v485_v28 = vmul.f32 %v3440_v11, %v3010_v63  ;;  %v377_v51 = vadd.f32 %v376_v56, %v375_v48  ;;  %v3045_v12 = vadd.f32 %v362_v6, %v361_v27  ;;  %v545_v45 = vsel %vm534_vm3, %v311_v18, %v544_v41 }
 0x115   :  { %v493_v44 = vmul.f32 %v3441_v22, %v383_v25  ;;  %v533_v3 = vsel %vm532_vm2, %v2905_v43, %v531_v47  ;;  %v3442_v16 = vrot.slane %v2975_v62, 7  ;;  %v353_v19 = vadd.f32 %v352_v40, %v351_v29 }
 0x116   :  { %v359_v60 = vadd.f32 %v358_v31, %v357_v30  ;;  %v370_v0 = vrot.slane %v369_v26, 1  ;;  %v621_v4 = vrot.slane %v485_v28, 3  ;;  %v546_v42 = vsel %vm536_vm4, %v3010_v63, %v545_v45 }
 0x117   :  { %v614_v46 = vsel %vm528_vm0, %v3442_v16, %v2929_v38  ;;  %v535_v48 = vsel %vm534_vm3, %v3007_v49, %v533_v3  ;;  %v3443_v18 = vrot.slane %v2897_v33, 6  ;;  %v625_v43 = vrot.slane %v493_v44, 1 }
 0x118   :  { %v547_v10 = vsel %vm538_vm5, %v359_v60, %v546_v42  ;;  %v537_v38 = vsel %vm536_vm4, %v3004_v50, %v535_v48  ;;  %v3444_v62 = vrot.slane %v2706_v53, 6  ;;  %v3445_v37 = vrot.slane %v2956_v1, 5  ;;  %v3465_v42 = vld [vmem:[#allocation22_spill] sm:$0xff]  ;;  %v3466_v48 = vld [vmem:[#allocation21_spill] sm:$0xff] }
 0x119   :  { %v616_v27 = vsel %vm530_vm1, %v3443_v18, %v614_v46  ;;  %v3070_v2 = vsel %vm540_vm6, %v383_v25, %v547_v10  ;;  %v539_v33 = vsel %vm538_vm5, %v353_v19, %v537_v38  ;;  %v3446_v6 = vrot.slane %v2704_v52, 5  ;;  %v3468_v10 = vld [vmem:[#allocation62_spill] sm:$0xff] }
 0x11a   :  { %v489_v56 = vmul.f32 %v3444_v62, %v359_v60  ;;  %v618_v63 = vsel %vm532_vm2, %v3445_v37, %v616_v27  ;;  %v3077_v29 = vadd.f32 %v370_v0, %v369_v26  ;;  %1277 = vmatprep.mubr.f32.mxu0 %v3070_v2  ;;  %1431 = vmatprep.mubr.f32.mxu1 %v3070_v2  ;;  %v3447_v25 = vrot.slane %v2704_v52, 6  ;;  %v3463_v0 = vld [vmem:[#allocation19_spill] sm:$0xff]  ;;  %v3471_v37 = vld [vmem:[#allocation64_spill] sm:$0xff] }
 0x11b   :  { %v620_v49 = vsel %vm534_vm3, %v619_v59, %v618_v63  ;;  %v484_v55 = vmul.f32 %v3446_v6, %v3004_v50  ;;  %v3082_v53 = vsel %vm540_vm6, %v377_v51, %v539_v33  ;;  %v3448_v50 = vrot.slane %v2704_v52, 7  ;;  %v3469_v62 = vld [vmem:[#allocation63_spill] sm:$0xff]  ;;  %v3473_v6 = vld [vmem:[#allocation24_spill] sm:$0xff] }
 0x11c   :  { %v623_v1 = vrot.slane %v489_v56, 2  ;;  %v488_v30 = vmul.f32 %v3447_v25, %v353_v19  ;;  %1278 = vmatmul.mubr.f32.vlgmr.msra.gmra.mrb[0].mxu0 %v3082_v53  ;;  %1432 = vmatmul.mubr.f32.vlgmr.msra.gmra.mrb[0].mxu1 %v3082_v53  ;;  %v622_v59 = vsel %vm536_vm4, %v621_v4, %v620_v49  ;;  %v3449_v41 = vrot.slane %v2970_v54, 7  ;;  %v3476_v25 = vld [vmem:[#allocation26_spill] sm:$0xff] }
 0x11d   :  { %v492_v26 = vmul.f32 %v3448_v50, %v377_v51  ;;  %v607_v11 = vrot.slane %v484_v55, 3  ;;  %v3450_v28 = vpack.c.bf16 %v2723_v8, %v2721_v7  ;;  %v3451_v22 = vpack.c.bf16 %v2730_v13, %v2725_v9  ;;  %v3456_v51 = vld [vmem:[#allocation54_spill] sm:$0xff]  ;;  %v3474_v55 = vld [vmem:[#allocation23_spill] sm:$0xff]  ;;  %v3479_v50 = vld [vmem:[#allocation56_spill] sm:$0xff] }
 0x11e   :  { %v600_v47 = vsel %vm528_vm0, %v3449_v41, %v2925_v39  ;;  %v624_v44 = vsel %vm538_vm5, %v623_v1, %v622_v59  ;;  %v3452_v40 = vrot.slane %v2892_v20, 6  ;;  %v609_v31 = vrot.slane %v488_v30, 2  ;;  %v3477_v30 = vld [vmem:[#allocation25_spill] sm:$0xff] }
 0x11f   :  { %1931 = vmatpush1.bf16.msra.mxu0 %v3450_v28  ;;  %2059 = vmatpush1.bf16.msra.mxu1 %v3451_v22  ;;  %v557_v54 = vsel %vm530_vm1, %v2881_v34, %v3000_v35  ;;  %v3109_v39 = vsel %vm540_vm6, %v625_v43, %v624_v44  ;;  %v3453_v7 = vpack.c.bf16 %v2734_v15, %v2732_v14  ;;  %v3455_v9 = vrot.slane %v2951_v36, 5  ;;  %v3458_v36 = vld [vmem:[#allocation17_spill] sm:$0xff]  ;;  %v3481_v28 = vld [vmem:[#allocation51_spill] sm:$0xff] }
 0x120   :  { %v602_v52 = vsel %vm530_vm1, %v3452_v40, %v600_v47  ;;  %v3454_v8 = vpack.c.bf16 %v2741_v24, %v2739_v23  ;;  %v611_v20 = vrot.slane %v492_v26, 1  ;;  %v558_v45 = vsel %vm532_vm2, %v3456_v51, %v557_v54  ;;  %1283 = vmatprep.mubr.f32.mxu0 %v3109_v39  ;;  %1437 = vmatprep.mubr.f32.mxu1 %v3109_v39  ;;  %v3457_v24 = vld [vmem:[#allocation52_spill] sm:$0xff]  ;;  %v3482_v44 = vld [vmem:[#allocation61_spill] sm:$0xff]  ;;  %v3488_v51 = vld [vmem:[#allocation30_spill] sm:$0xff] }
 0x121   :  { %1933 = vmatprep.subr.bf16.mxu0 %v3453_v7  ;;  %v604_v13 = vsel %vm532_vm2, %v3455_v9, %v602_v52  ;;  %v364_v34 = vrot.slane %v3045_v12, 1  ;;  %v395_v15 = vadd.f32 %v394_v5, %v3027_v61  ;;  %v559_v23 = vsel %vm534_vm3, %v3024_v21, %v558_v45  ;;  %v3462_v5 = vld [vmem:[#allocation20_spill] sm:$0xff]  ;;  %v3489_v45 = vld [vmem:[#allocation29_spill] sm:$0xff] }
 0x122   :  { %2061 = vmatprep.subr.bf16.mxu1 %v3454_v8  ;;  %v606_v14 = vsel %vm534_vm3, %v605_v57, %v604_v13  ;;  %v3459_v35 = vrot.slane %v3458_v36, 1  ;;  %v388_v16 = vrot.slane %v3032_v58, 1  ;;  %v560_v19 = vsel %vm536_vm4, %v3012_v17, %v559_v23  ;;  %v3485_v9 = vld [vmem:[#allocation28_spill] sm:$0xff]  ;;  %v3486_v13 = vld [vmem:[#allocation27_spill] sm:$0xff] }
 0x123   :  { %v608_v46 = vsel %vm536_vm4, %v607_v11, %v606_v14  ;;  %v3461_v57 = vrot.slane %v3460_v32, 4  ;;  %v3464_v4 = vpack.c.bf16 %v3462_v5, %v3463_v0  ;;  %v3467_v18 = vpack.c.bf16 %v3465_v42, %v3466_v48  ;;  %v3480_v11 = vld [vmem:[#allocation59_spill] sm:$0xff]  ;;  %v3499_v0 = vld [vmem:[#allocation58_spill] sm:$0xff] }
 0x124   :  { %v3134_v3 = vmul.f32 %v3459_v35, %v3457_v24  ;;  %v610_v61 = vsel %vm538_vm5, %v609_v31, %v608_v46  ;;  %v561_v27 = vsel %vm538_vm5, %v3077_v29, %v560_v19  ;;  %v430_v43 = vrot.slane %v3458_v36, 7  ;;  %v3494_v46 = vld [vmem:[#allocation31_spill] sm:$0xff] }
 0x125   :  { %v483_v60 = vmul.f32 %v3461_v57, %v3024_v21  ;;  %1935 = vmatpush1.bf16.msra.mxu0 %v3464_v4  ;;  %2063 = vmatpush1.bf16.msra.mxu1 %v3467_v18  ;;  %v641_v38 = vrot.slane %v3468_v10, 7  ;;  %v3470_v21 = vrot.slane %v3469_v62, 1  ;;  %v3472_v63 = vrot.slane %v3458_v36, 4  ;;  %v3496_v57 = vld [vmem:[#allocation34_spill] sm:$0xff] }
 0x126   :  { %v3163_v49 = vsel %vm540_vm6, %v611_v20, %v610_v61  ;;  %v3475_v1 = vpack.c.bf16 %v3473_v6, %v3474_v55  ;;  %v3478_v59 = vpack.c.bf16 %v3476_v25, %v3477_v30  ;;  %v643_v26 = vrot.slane %v3479_v50, 6  ;;  %v3505_v55 = vld [vmem:[#allocation38_spill] sm:$0xff]  ;;  %v995_v30 = vld [vmem:[#allocation8 + $0xa80] sm:$0xff] }
 0x127   :  { %v341_v56 = vadd.f32 %v3470_v21, %v3469_v62  ;;  %v3160_v33 = vmul.f32 %v3472_v63, %v3471_v37  ;;  %v365_v41 = vadd.f32 %v364_v34, %v3045_v12  ;;  %1284 = vmatmul.mubr.f32.gmra.mrb[2].mxu0 %v3163_v49  ;;  %1438 = vmatmul.mubr.f32.gmra.mrb[2].mxu1 %v3163_v49  ;;  %v645_v40 = vrot.slane %v3482_v44, 5  ;;  %v3483_v12 = vld [vmem:[#allocation53_spill] sm:$0xff]  ;;  %v3503_v63 = vld [vmem:[#allocation35_spill] sm:$0xff]  ;;  %v3510_v44 = vld [vmem:[#allocation40_spill] sm:$0xff] }
 0x128   :  { %1937 = vmatprep.subr.bf16.mxu0 %v3475_v1  ;;  %2065 = vmatprep.subr.bf16.mxu1 %v3478_v59  ;;  %v3176_v47 = vsel %vm540_vm6, %v395_v15, %v561_v27  ;;  %v550_v22 = vsel %vm530_vm1, %v3481_v28, %v3480_v11  ;;  %v389_v52 = vadd.f32 %v388_v16, %v3032_v58  ;;  %v3484_v54 = vrot.slane %v3460_v32, 5  ;;  %v3493_v16 = vld [vmem:[#allocation32_spill] sm:$0xff]  ;;  %v3506_v1 = vld [vmem:[#allocation37_spill] sm:$0xff]  ;;  %v1003_v59 = vld [vmem:[#allocation8 + $0xac0] sm:$0xff] }
 0x129   :  { %1354 = vmatprep.mubr.f32.mxu0 %v3176_v47  ;;  %1508 = vmatprep.mubr.f32.mxu1 %v3176_v47  ;;  %v551_v31 = vsel %vm532_vm2, %v3483_v12, %v550_v22  ;;  %v647_v8 = vrot.slane %v483_v60, 4  ;;  %v3487_v20 = vpack.c.bf16 %v3485_v9, %v3486_v13  ;;  %v3490_v34 = vpack.c.bf16 %v3488_v51, %v3489_v45  ;;  %v3497_v60 = vld [vmem:[#allocation33_spill] sm:$0xff]  ;;  %v3509_v22 = vld [vmem:[#allocation60_spill] sm:$0xff]  ;;  %v3513_v12 = vld [vmem:[#allocation42_spill] sm:$0xff] }
 0x12a   :  { %v487_v7 = vmul.f32 %v3484_v54, %v3012_v17  ;;  %v552_v58 = vsel %vm534_vm3, %v3471_v37, %v551_v31  ;;  %v3491_v14 = vrot.slane %v3460_v32, 6  ;;  %v3492_v24 = vrot.slane %v3460_v32, 7  ;;  %v3514_v31 = vld [vmem:[#allocation41_spill] sm:$0xff]  ;;  %v1012_v13 = vld [vmem:[#allocation8 + $0xb08] sm:$0xff]  ;;  %v1022_v51 = vld [vmem:[#allocation8 + $0xb58] sm:$0xff] }
 0x12b   :  { %1939 = vmatpush1.bf16.msra.mxu0 %v3487_v20  ;;  %2067 = vmatpush1.bf16.msra.mxu1 %v3490_v34  ;;  %v627_v17 = vrot.slane %v3134_v3, 7  ;;  %v3495_v19 = vpack.c.bf16 %v3493_v16, %v3494_v46  ;;  %v3498_v61 = vpack.c.bf16 %v3496_v57, %v3497_v60  ;;  %v553_v5 = vsel %vm536_vm4, %v341_v56, %v552_v58  ;;  %v1005_v9 = vld [vmem:[#allocation8 + $0xad0] sm:$0xff]  ;;  %v3518_v16 = vld [vmem:[#allocation43_spill] sm:$0xff] }
 0x12c   :  { %v491_v23 = vmul.f32 %v3491_v14, %v3077_v29  ;;  %v495_v35 = vmul.f32 %v3492_v24, %v395_v15  ;;  %v642_v4 = vsel %vm528_vm0, %v641_v38, %v3499_v0  ;;  %v649_v42 = vrot.slane %v487_v7, 3  ;;  %v3500_v29 = vld [vmem:[#allocation55_spill] sm:$0xff]  ;;  %v3502_v38 = vld [vmem:[#allocation36_spill] sm:$0xff]  ;;  %v997_v7 = vld [vmem:[#allocation8 + $0xa90] sm:$0xff] }
 0x12d   :  { %1941 = vmatprep.subr.bf16.mxu0 %v3495_v19  ;;  %2069 = vmatprep.subr.bf16.mxu1 %v3498_v61  ;;  %v629_v48 = vrot.slane %v3500_v29, 6  ;;  %v554_v15 = vsel %vm538_vm5, %v365_v41, %v553_v5  ;;  %v644_v3 = vsel %vm530_vm1, %v643_v26, %v642_v4  ;;  %v3501_v62 = vrot.slane %v3458_v36, 5  ;;  %v3521_v19 = vld [vmem:[#allocation45_spill] sm:$0xff]  ;;  %v1011_v5 = vld [vmem:[#allocation8 + $0xb00] sm:$0xff] }
 0x12e   :  { %v651_v32 = vrot.slane %v491_v23, 2  ;;  %v3217_v18 = vsel %vm540_vm6, %v389_v52, %v554_v15  ;;  %v646_v27 = vsel %vm532_vm2, %v645_v40, %v644_v3  ;;  %v653_v10 = vrot.slane %v495_v35, 1  ;;  %v3517_v35 = vld [vmem:[#allocation44_spill] sm:$0xff]  ;;  %v1019_v0 = vld [vmem:[#allocation8 + $0xb40] sm:$0xff]  ;;  %v3526_v15 = vld [vmem:[#allocation50_spill] sm:$0xff] }
 0x12f   :  { %v486_v21 = vmul.f32 %v3501_v62, %v341_v56  ;;  %v633_v37 = vrot.slane %v3160_v33, 4  ;;  %v3504_v6 = vpack.c.bf16 %v3502_v38, %v3503_v63  ;;  %v3507_v25 = vpack.c.bf16 %v3505_v55, %v3506_v1  ;;  %v3511_v33 = vld [vmem:[#allocation39_spill] sm:$0xff]  ;;  %v3527_v3 = vld [vmem:[#allocation49_spill] sm:$0xff]  ;;  %v1028_v38 = vld [vmem:[#allocation8 + $0xb88] sm:$0xff] }
 0x130   :  { %v648_v50 = vsel %vm534_vm3, %v647_v8, %v646_v27  ;;  %v3508_v26 = vrot.slane %v3458_v36, 6  ;;  %v494_v28 = vmul.f32 %v430_v43, %v389_v52  ;;  %v631_v56 = vrot.slane %v3509_v22, 5  ;;  %v3516_v8 = vld [vmem:[#allocation57_spill] sm:$0xff]  ;;  %v1020_v43 = vld [vmem:[#allocation8 + $0xb48] sm:$0xff]  ;;  %v1014_v52 = vld [vmem:[#allocation8 + $0xb18] sm:$0xff] }
 0x131   :  { %1943 = vmatpush1.bf16.msra.mxu0 %v3504_v6  ;;  %2071 = vmatpush1.bf16.msra.mxu1 %v3507_v25  ;;  %v3512_v40 = vpack.c.bf16 %v3510_v44, %v3511_v33  ;;  %v3515_v54 = vpack.c.bf16 %v3513_v12, %v3514_v31  ;;  %v650_v20 = vsel %vm536_vm4, %v649_v42, %v648_v50  ;;  %v3523_v42 = vld [vmem:[#allocation48_spill] sm:$0xff]  ;;  %v3524_v29 = vld [vmem:[#allocation47_spill] sm:$0xff]  ;;  %v1013_v62 = vld [vmem:[#allocation8 + $0xb10] sm:$0xff] }
 0x132   :  { %v490_v11 = vmul.f32 %v3508_v26, %v365_v41  ;;  %v628_v36 = vsel %vm528_vm0, %v627_v17, %v3516_v8  ;;  %v635_v41 = vrot.slane %v486_v21, 3  ;;  %v652_v45 = vsel %vm538_vm5, %v651_v32, %v650_v20  ;;  %v3520_v17 = vld [vmem:[#allocation46_spill] sm:$0xff]  ;;  %v1021_v21 = vld [vmem:[#allocation8 + $0xb50] sm:$0xff]  ;;  %v1036_v6 = vld [vmem:[#allocation8 + $0xbc8] sm:$0xff] }
 0x133   :  { %1945 = vmatprep.subr.bf16.mxu0 %v3512_v40  ;;  %2073 = vmatprep.subr.bf16.mxu1 %v3515_v54  ;;  %v630_v34 = vsel %vm530_vm1, %v629_v48, %v628_v36  ;;  %v3245_v14 = vsel %vm540_vm6, %v653_v10, %v652_v45  ;;  %v639_v24 = vrot.slane %v494_v28, 1  ;;  %v3519_v46 = vpack.c.bf16 %v3517_v35, %v3518_v16  ;;  %v1030_v55 = vld [vmem:[#allocation8 + $0xb98] sm:$0xff]  ;;  %v1027_v50 = vld [vmem:[#allocation8 + $0xb80] sm:$0xff]  ;;  %v1029_v22 = vld [vmem:[#allocation8 + $0xb90] sm:$0xff] }
 0x134   :  { %v637_v58 = vrot.slane %v490_v11, 2  ;;  %v632_v23 = vsel %vm532_vm2, %v631_v56, %v630_v34  ;;  %v3522_v57 = vpack.c.bf16 %v3520_v17, %v3521_v19  ;;  %v1950_v60 = vpack.c.bf16 %v1003_v59, %v995_v30  ;;  %v1038_v1 = vld [vmem:[#allocation8 + $0xbd8] sm:$0xff]  ;;  %v1035_v26 = vld [vmem:[#allocation8 + $0xbc0] sm:$0xff]  ;;  %v1037_v56 = vld [vmem:[#allocation8 + $0xbd0] sm:$0xff] }
 0x135   :  { %1947 = vmatpush1.bf16.msra.mxu0 %v3519_v46  ;;  %v2078_v61 = vpack.c.bf16 %v1005_v9, %v997_v7  ;;  %v634_v4 = vsel %vm534_vm3, %v633_v37, %v632_v23  ;;  %v3525_v48 = vpack.c.bf16 %v3523_v42, %v3524_v29  ;;  %v3528_v32 = vpack.c.bf16 %v3526_v15, %v3527_v3  ;;  %v1044_v44 = vld [vmem:[#allocation8 + $0xc08] sm:$0xff]  ;;  %v1046_v40 = vld [vmem:[#allocation8 + $0xc18] sm:$0xff]  ;;  %v1043_v7 = vld [vmem:[#allocation8 + $0xc00] sm:$0xff] }
 0x136   :  { %2075 = vmatpush1.bf16.msra.mxu1 %v3522_v57  ;;  %v1952_v27 = vpack.c.bf16 %v1020_v43, %v1012_v13  ;;  %v2080_v10 = vpack.c.bf16 %v1022_v51, %v1014_v52  ;;  %v636_v63 = vsel %vm536_vm4, %v635_v41, %v634_v4  ;;  %v1954_v30 = vpack.c.bf16 %v1019_v0, %v1011_v5  ;;  %v1052_v33 = vld [vmem:[#allocation8 + $0xc48] sm:$0xff]  ;;  %v1054_v12 = vld [vmem:[#allocation8 + $0xc58] sm:$0xff]  ;;  %v1051_v9 = vld [vmem:[#allocation8 + $0xc40] sm:$0xff] }
 0x137   :  { %1949 = vmatprep.subr.bf16.mxu0 %v3525_v48  ;;  %2077 = vmatprep.subr.bf16.mxu1 %v3528_v32  ;;  %v638_v37 = vsel %vm538_vm5, %v637_v58, %v636_v63  ;;  %v2082_v59 = vpack.c.bf16 %v1021_v21, %v1013_v62  ;;  %v1956_v11 = vpack.c.bf16 %v1036_v6, %v1028_v38  ;;  %v1045_v8 = vld [vmem:[#allocation8 + $0xc10] sm:$0xff]  ;;  %v1060_v41 = vld [vmem:[#allocation8 + $0xc88] sm:$0xff]  ;;  %v1062_v52 = vld [vmem:[#allocation8 + $0xc98] sm:$0xff] }
 0x138   :  { %v3264_v25 = vsel %vm540_vm6, %v639_v24, %v638_v37  ;;  %v2084_v28 = vpack.c.bf16 %v1038_v1, %v1030_v55  ;;  %v1958_v31 = vpack.c.bf16 %v1035_v26, %v1027_v50  ;;  %v2086_v54 = vpack.c.bf16 %v1037_v56, %v1029_v22  ;;  %v1053_v36 = vld [vmem:[#allocation8 + $0xc50] sm:$0xff]  ;;  %v1068_v43 = vld [vmem:[#allocation8 + $0xcc8] sm:$0xff]  ;;  %v1070_v51 = vld [vmem:[#allocation8 + $0xcd8] sm:$0xff] }
 0x139   :  { %1951 = vmatpush1.bf16.msra.mxu0 %v1950_v60  ;;  %v1960_v13 = vpack.c.bf16 %v1052_v33, %v1044_v44  ;;  %v2088_v20 = vpack.c.bf16 %v1054_v12, %v1046_v40  ;;  %v1962_v45 = vpack.c.bf16 %v1051_v9, %v1043_v7  ;;  %v2090_v34 = vpack.c.bf16 %v1053_v36, %v1045_v8  ;;  %v1059_v58 = vld [vmem:[#allocation8 + $0xc80] sm:$0xff]  ;;  %v1061_v16 = vld [vmem:[#allocation8 + $0xc90] sm:$0xff]  ;;  %v1076_v17 = vld [vmem:[#allocation8 + $0xd08] sm:$0xff] }
 0x13a   :  { %2079 = vmatpush1.bf16.msra.mxu1 %v2078_v61  ;;  %1953 = vmatprep.subr.bf16.mxu0 %v1952_v27  ;;  %v1067_v23 = vld [vmem:[#allocation8 + $0xcc0] sm:$0xff]  ;;  %v1964_v24 = vpack.c.bf16 %v1068_v43, %v1060_v41  ;;  %v2092_v35 = vpack.c.bf16 %v1070_v51, %v1062_v52  ;;  %v1069_v46 = vld [vmem:[#allocation8 + $0xcd0] sm:$0xff]  ;;  %v1084_v19 = vld [vmem:[#allocation8 + $0xd48] sm:$0xff] }
 0x13b   :  { %2081 = vmatprep.subr.bf16.mxu1 %v2080_v10  ;;  %v1078_v57 = vld [vmem:[#allocation8 + $0xd18] sm:$0xff]  ;;  %v1966_v61 = vpack.c.bf16 %v1067_v23, %v1059_v58  ;;  %v2094_v5 = vpack.c.bf16 %v1069_v46, %v1061_v16  ;;  %v1075_v0 = vld [vmem:[#allocation8 + $0xd00] sm:$0xff]  ;;  %v1968_v42 = vpack.c.bf16 %v1084_v19, %v1076_v17  ;;  %v1077_v48 = vld [vmem:[#allocation8 + $0xd10] sm:$0xff] }
 0x13c   :  { %v1086_v60 = vld [vmem:[#allocation8 + $0xd58] sm:$0xff]  ;;  %v1083_v4 = vld [vmem:[#allocation8 + $0xd40] sm:$0xff]  ;;  %v1085_v15 = vld [vmem:[#allocation8 + $0xd50] sm:$0xff] }
 0x13d   :  { %1955 = vmatpush1.bf16.msra.mxu0 %v1954_v30  ;;  %v2096_v29 = vpack.c.bf16 %v1086_v60, %v1078_v57  ;;  %v1092_v3 = vld [vmem:[#allocation8 + $0xd88] sm:$0xff]  ;;  %v1094_v27 = vld [vmem:[#allocation8 + $0xd98] sm:$0xff]  ;;  %v1970_v62 = vpack.c.bf16 %v1083_v4, %v1075_v0  ;;  %v2098_v21 = vpack.c.bf16 %v1085_v15, %v1077_v48  ;;  %v1091_v38 = vld [vmem:[#allocation8 + $0xd80] sm:$0xff] }
 0x13e   :  { %2083 = vmatpush1.bf16.msra.mxu1 %v2082_v59  ;;  %1957 = vmatprep.subr.bf16.mxu0 %v1956_v11  ;;  %v1100_v32 = vld [vmem:[#allocation8 + $0xdc8] sm:$0xff]  ;;  %v1102_v10 = vld [vmem:[#allocation8 + $0xdd8] sm:$0xff]  ;;  %v1099_v63 = vld [vmem:[#allocation8 + $0xdc0] sm:$0xff] }
 0x13f   :  { %2085 = vmatprep.subr.bf16.mxu1 %v2084_v28  ;;  %v1972_v6 = vpack.c.bf16 %v1100_v32, %v1092_v3  ;;  %v2100_v55 = vpack.c.bf16 %v1102_v10, %v1094_v27  ;;  %v1093_v1 = vld [vmem:[#allocation8 + $0xd90] sm:$0xff]  ;;  %v1108_v30 = vld [vmem:[#allocation8 + $0xe08] sm:$0xff]  ;;  %v1110_v50 = vld [vmem:[#allocation8 + $0xe18] sm:$0xff]  ;;  %v1974_v11 = vpack.c.bf16 %v1099_v63, %v1091_v38 }
 0x140   :  { %v1101_v37 = vld [vmem:[#allocation8 + $0xdd0] sm:$0xff]  ;;  %v1116_v59 = vld [vmem:[#allocation8 + $0xe48] sm:$0xff]  ;;  %v1118_v26 = vld [vmem:[#allocation8 + $0xe58] sm:$0xff] }
 0x141   :  { %1959 = vmatpush1.bf16.msra.mxu0 %v1958_v31  ;;  %v2102_v28 = vpack.c.bf16 %v1101_v37, %v1093_v1  ;;  %v1107_v22 = vld [vmem:[#allocation8 + $0xe00] sm:$0xff]  ;;  %v1976_v44 = vpack.c.bf16 %v1116_v59, %v1108_v30  ;;  %v2104_v33 = vpack.c.bf16 %v1118_v26, %v1110_v50  ;;  %v1109_v40 = vld [vmem:[#allocation8 + $0xe10] sm:$0xff]  ;;  %v1124_v31 = vld [vmem:[#allocation8 + $0xe88] sm:$0xff] }
 0x142   :  { %2087 = vmatpush1.bf16.msra.mxu1 %v2086_v54  ;;  %1961 = vmatprep.subr.bf16.mxu0 %v1960_v13  ;;  %v1115_v56 = vld [vmem:[#allocation8 + $0xe40] sm:$0xff]  ;;  %v1117_v12 = vld [vmem:[#allocation8 + $0xe50] sm:$0xff]  ;;  %v1132_v54 = vld [vmem:[#allocation8 + $0xec8] sm:$0xff] }
 0x143   :  { %2089 = vmatprep.subr.bf16.mxu1 %v2088_v20  ;;  %v1126_v7 = vld [vmem:[#allocation8 + $0xe98] sm:$0xff]  ;;  %v1978_v13 = vpack.c.bf16 %v1115_v56, %v1107_v22  ;;  %v2106_v20 = vpack.c.bf16 %v1117_v12, %v1109_v40  ;;  %v1123_v8 = vld [vmem:[#allocation8 + $0xe80] sm:$0xff]  ;;  %v1980_v41 = vpack.c.bf16 %v1132_v54, %v1124_v31  ;;  %v1125_v52 = vld [vmem:[#allocation8 + $0xe90] sm:$0xff] }
 0x144   :  { %v1134_v9 = vld [vmem:[#allocation8 + $0xed8] sm:$0xff]  ;;  %v1131_v36 = vld [vmem:[#allocation8 + $0xec0] sm:$0xff]  ;;  %v1133_v51 = vld [vmem:[#allocation8 + $0xed0] sm:$0xff] }
 0x145   :  { %1963 = vmatpush1.bf16.msra.mxu0 %v1962_v45  ;;  %v2108_v43 = vpack.c.bf16 %v1134_v9, %v1126_v7  ;;  %v1140_v45 = vld [vmem:[#allocation8 + $0xf08] sm:$0xff]  ;;  %v1142_v58 = vld [vmem:[#allocation8 + $0xf18] sm:$0xff]  ;;  %v1139_v16 = vld [vmem:[#allocation8 + $0xf00] sm:$0xff] }
 0x146   :  { %2091 = vmatpush1.bf16.msra.mxu1 %v2090_v34  ;;  %1965 = vmatprep.subr.bf16.mxu0 %v1964_v24  ;;  %v1148_v34 = vld [vmem:[#allocation8 + $0xf48] sm:$0xff]  ;;  %v1150_v23 = vld [vmem:[#allocation8 + $0xf58] sm:$0xff]  ;;  %v1982_v24 = vpack.c.bf16 %v1131_v36, %v1123_v8  ;;  %v1147_v46 = vld [vmem:[#allocation8 + $0xf40] sm:$0xff] }
 0x147   :  { %2093 = vmatprep.subr.bf16.mxu1 %v2092_v35  ;;  %v2110_v35 = vpack.c.bf16 %v1133_v51, %v1125_v52  ;;  %v1984_v17 = vpack.c.bf16 %v1148_v34, %v1140_v45  ;;  %v2112_v19 = vpack.c.bf16 %v1150_v23, %v1142_v58  ;;  %v1141_v57 = vld [vmem:[#allocation8 + $0xf10] sm:$0xff]  ;;  %v1158_v0 = vld [vmem:[#allocation8 + $0xf98] sm:$0xff]  ;;  %v1155_v48 = vld [vmem:[#allocation8 + $0xf80] sm:$0xff] }
 0x148   :  { %v1149_v60 = vld [vmem:[#allocation8 + $0xf50] sm:$0xff]  ;;  %v1166_v4 = vld [vmem:[#allocation8 + $0xfd8] sm:$0xff]  ;;  %v1163_v15 = vld [vmem:[#allocation8 + $0xfc0] sm:$0xff] }
 0x149   :  { %1967 = vmatpush1.bf16.msra.mxu0 %v1966_v61  ;;  %v1156_v61 = vld [vmem:[#allocation8 + $0xf88] sm:$0xff]  ;;  %v2116_v32 = vpack.c.bf16 %v1166_v4, %v1158_v0  ;;  %v1157_v27 = vld [vmem:[#allocation8 + $0xf90] sm:$0xff]  ;;  %v666_v38 = vld [vmem:[#allocation8 + $0x38] sm:$0xff] }
 0x14a   :  { %2095 = vmatpush1.bf16.msra.mxu1 %v2094_v5  ;;  %1969 = vmatprep.subr.bf16.mxu0 %v1968_v42  ;;  %v1164_v5 = vld [vmem:[#allocation8 + $0xfc8] sm:$0xff]  ;;  %v1986_v42 = vpack.c.bf16 %v1147_v46, %v1139_v16  ;;  %v1165_v10 = vld [vmem:[#allocation8 + $0xfd0] sm:$0xff]  ;;  %v674_v63 = vld [vmem:[#allocation8 + $0x78] sm:$0xff] }
 0x14b   :  { %2097 = vmatprep.subr.bf16.mxu1 %v2096_v29  ;;  %v2114_v29 = vpack.c.bf16 %v1149_v60, %v1141_v57  ;;  %v1988_v3 = vpack.c.bf16 %v1164_v5, %v1156_v61  ;;  %v2248_v37 = vpack.c.bf16 %v674_v63, %v666_v38  ;;  %v663_v30 = vld [vmem:[#allocation8 + $0x20] sm:$0xff]  ;;  %v665_v50 = vld [vmem:[#allocation8 + $0x30] sm:$0xff]  ;;  %v682_v22 = vld [vmem:[#allocation8 + $0xb8] sm:$0xff] }
 0x14c   :  { %v671_v59 = vld [vmem:[#allocation8 + $0x60] sm:$0xff]  ;;  %v673_v26 = vld [vmem:[#allocation8 + $0x70] sm:$0xff]  ;;  %v690_v56 = vld [vmem:[#allocation8 + $0xf8] sm:$0xff] }
 0x14d   :  { %1971 = vmatpush1.bf16.msra.mxu0 %v1970_v62  ;;  %v664_v62 = vld [vmem:[#allocation8 + $0x28] sm:$0xff]  ;;  %v679_v40 = vld [vmem:[#allocation8 + $0xa0] sm:$0xff]  ;;  %v2252_v54 = vpack.c.bf16 %v690_v56, %v682_v22  ;;  %v681_v7 = vld [vmem:[#allocation8 + $0xb0] sm:$0xff] }
 0x14e   :  { %2099 = vmatpush1.bf16.msra.mxu1 %v2098_v21  ;;  %1973 = vmatprep.subr.bf16.mxu0 %v1972_v6  ;;  %v672_v21 = vld [vmem:[#allocation8 + $0x68] sm:$0xff]  ;;  %v1990_v6 = vpack.c.bf16 %v1163_v15, %v1155_v48  ;;  %v687_v12 = vld [vmem:[#allocation8 + $0xe0] sm:$0xff]  ;;  %v689_v9 = vld [vmem:[#allocation8 + $0xf0] sm:$0xff] }
 0x14f   :  { %2101 = vmatprep.subr.bf16.mxu1 %v2100_v55  ;;  %v2118_v55 = vpack.c.bf16 %v1165_v10, %v1157_v27  ;;  %v2120_v1 = vpack.c.bf16 %v672_v21, %v664_v62  ;;  %v698_v8 = vld [vmem:[#allocation8 + $0x138] sm:$0xff]  ;;  %v695_v52 = vld [vmem:[#allocation8 + $0x120] sm:$0xff]  ;;  %v697_v58 = vld [vmem:[#allocation8 + $0x130] sm:$0xff] }
 0x150   :  { %v706_v36 = vld [vmem:[#allocation8 + $0x178] sm:$0xff]  ;;  %v703_v51 = vld [vmem:[#allocation8 + $0x160] sm:$0xff]  ;;  %v705_v23 = vld [vmem:[#allocation8 + $0x170] sm:$0xff] }
 0x151   :  { %1975 = vmatpush1.bf16.msra.mxu0 %v1974_v11  ;;  %v680_v11 = vld [vmem:[#allocation8 + $0xa8] sm:$0xff]  ;;  %v2256_v34 = vpack.c.bf16 %v706_v36, %v698_v8  ;;  %v714_v16 = vld [vmem:[#allocation8 + $0x1b8] sm:$0xff]  ;;  %v711_v57 = vld [vmem:[#allocation8 + $0x1a0] sm:$0xff] }
 0x152   :  { %2103 = vmatpush1.bf16.msra.mxu1 %v2102_v28  ;;  %1977 = vmatprep.subr.bf16.mxu0 %v1976_v44  ;;  %v688_v28 = vld [vmem:[#allocation8 + $0xe8] sm:$0xff]  ;;  %v2122_v44 = vpack.c.bf16 %v671_v59, %v663_v30  ;;  %v722_v46 = vld [vmem:[#allocation8 + $0x1f8] sm:$0xff]  ;;  %v719_v60 = vld [vmem:[#allocation8 + $0x1e0] sm:$0xff] }
 0x153   :  { %2105 = vmatprep.subr.bf16.mxu1 %v2104_v33  ;;  %v2250_v33 = vpack.c.bf16 %v673_v26, %v665_v50  ;;  %v2124_v31 = vpack.c.bf16 %v688_v28, %v680_v11  ;;  %v2260_v5 = vpack.c.bf16 %v722_v46, %v714_v16  ;;  %v713_v0 = vld [vmem:[#allocation8 + $0x1b0] sm:$0xff]  ;;  %v730_v48 = vld [vmem:[#allocation8 + $0x238] sm:$0xff]  ;;  %v735_v27 = vld [vmem:[#allocation8 + $0x260] sm:$0xff] }
 0x154   :  { %v721_v4 = vld [vmem:[#allocation8 + $0x1f0] sm:$0xff]  ;;  %v738_v15 = vld [vmem:[#allocation8 + $0x278] sm:$0xff]  ;;  %v744_v63 = vld [vmem:[#allocation8 + $0x2a8] sm:$0xff] }
 0x155   :  { %1979 = vmatpush1.bf16.msra.mxu0 %v1978_v13  ;;  %v696_v13 = vld [vmem:[#allocation8 + $0x128] sm:$0xff]  ;;  %v2264_v62 = vpack.c.bf16 %v738_v15, %v730_v48  ;;  %v729_v21 = vld [vmem:[#allocation8 + $0x230] sm:$0xff]  ;;  %v743_v59 = vld [vmem:[#allocation8 + $0x2a0] sm:$0xff] }
 0x156   :  { %2107 = vmatpush1.bf16.msra.mxu1 %v2106_v20  ;;  %1981 = vmatprep.subr.bf16.mxu0 %v1980_v41  ;;  %v704_v20 = vld [vmem:[#allocation8 + $0x168] sm:$0xff]  ;;  %v2126_v41 = vpack.c.bf16 %v687_v12, %v679_v40  ;;  %v737_v38 = vld [vmem:[#allocation8 + $0x270] sm:$0xff]  ;;  %v751_v50 = vld [vmem:[#allocation8 + $0x2e0] sm:$0xff] }
 0x157   :  { %2109 = vmatprep.subr.bf16.mxu1 %v2108_v43  ;;  %v2254_v43 = vpack.c.bf16 %v689_v9, %v681_v7  ;;  %v2128_v45 = vpack.c.bf16 %v704_v20, %v696_v13  ;;  %v2266_v30 = vpack.c.bf16 %v737_v38, %v729_v21  ;;  %v745_v28 = vld [vmem:[#allocation8 + $0x2b0] sm:$0xff]  ;;  %v760_v56 = vld [vmem:[#allocation8 + $0x328] sm:$0xff]  ;;  %v770_v40 = vld [vmem:[#allocation8 + $0x378] sm:$0xff]  ;;  %v2142_v12 = vpack.c.bf16 %v751_v50, %v743_v59 }
 0x158   :  { %v753_v22 = vld [vmem:[#allocation8 + $0x2f0] sm:$0xff]  ;;  %v767_v7 = vld [vmem:[#allocation8 + $0x360] sm:$0xff]  ;;  %v776_v36 = vld [vmem:[#allocation8 + $0x3a8] sm:$0xff] }
 0x159   :  { %1983 = vmatpush1.bf16.msra.mxu0 %v1982_v24  ;;  %v712_v24 = vld [vmem:[#allocation8 + $0x1a8] sm:$0xff]  ;;  %v761_v20 = vld [vmem:[#allocation8 + $0x330] sm:$0xff]  ;;  %v815_v21 = vld [vmem:[#allocation8 + $0x4e0] sm:$0xff] }
 0x15a   :  { %2111 = vmatpush1.bf16.msra.mxu1 %v2110_v35  ;;  %1985 = vmatprep.subr.bf16.mxu0 %v1984_v17  ;;  %v720_v35 = vld [vmem:[#allocation8 + $0x1e8] sm:$0xff]  ;;  %v2130_v17 = vpack.c.bf16 %v703_v51, %v695_v52  ;;  %v769_v8 = vld [vmem:[#allocation8 + $0x370] sm:$0xff]  ;;  %v786_v52 = vld [vmem:[#allocation8 + $0x3f8] sm:$0xff] }
 0x15b   :  { %2113 = vmatprep.subr.bf16.mxu1 %v2112_v19  ;;  %v2258_v19 = vpack.c.bf16 %v705_v23, %v697_v58  ;;  %v2132_v61 = vpack.c.bf16 %v720_v35, %v712_v24  ;;  %v783_v58 = vld [vmem:[#allocation8 + $0x3e0] sm:$0xff]  ;;  %v777_v35 = vld [vmem:[#allocation8 + $0x3b0] sm:$0xff]  ;;  %v792_v46 = vld [vmem:[#allocation8 + $0x428] sm:$0xff] }
 0x15c   :  { %v785_v16 = vld [vmem:[#allocation8 + $0x3f0] sm:$0xff]  ;;  %v808_v15 = vld [vmem:[#allocation8 + $0x4a8] sm:$0xff]  ;;  %v834_v59 = vld [vmem:[#allocation8 + $0x578] sm:$0xff] }
 0x15d   :  { %1987 = vmatpush1.bf16.msra.mxu0 %v1986_v42  ;;  %v728_v42 = vld [vmem:[#allocation8 + $0x228] sm:$0xff]  ;;  %v801_v48 = vld [vmem:[#allocation8 + $0x470] sm:$0xff] }
 0x15e   :  { %2115 = vmatpush1.bf16.msra.mxu1 %v2114_v29  ;;  %1989 = vmatprep.subr.bf16.mxu0 %v1988_v3  ;;  %v736_v29 = vld [vmem:[#allocation8 + $0x268] sm:$0xff]  ;;  %v2134_v3 = vpack.c.bf16 %v719_v60, %v711_v57  ;;  %v802_v57 = vld [vmem:[#allocation8 + $0x478] sm:$0xff] }
 0x15f   :  { %2117 = vmatprep.subr.bf16.mxu1 %v2116_v32  ;;  %v727_v32 = vld [vmem:[#allocation8 + $0x220] sm:$0xff]  ;;  %v2136_v10 = vpack.c.bf16 %v736_v29, %v728_v42  ;;  %v793_v29 = vld [vmem:[#allocation8 + $0x430] sm:$0xff] }
 0x161   :  { %1991 = vmatpush1.bf16.msra.mxu0 %v1990_v6  ;;  %v752_v6 = vld [vmem:[#allocation8 + $0x2e8] sm:$0xff] }
 0x162   :  { %2119 = vmatpush1.bf16.msra.mxu1 %v2118_v55  ;;  %2121 = vmatprep.subr.bf16.mxu0 %v2120_v1  ;;  %v746_v55 = vld [vmem:[#allocation8 + $0x2b8] sm:$0xff]  ;;  %v2140_v26 = vpack.c.bf16 %v752_v6, %v744_v63  ;;  %v809_v6 = vld [vmem:[#allocation8 + $0x4b0] sm:$0xff] }
 0x163   :  { %2249 = vmatprep.subr.bf16.mxu1 %v2248_v37  ;;  %v754_v1 = vld [vmem:[#allocation8 + $0x2f8] sm:$0xff]  ;;  %v2138_v37 = vpack.c.bf16 %v735_v27, %v727_v32 }
 0x164   :  { %1355 = vmatmul.mubr.f32.vlgmr.msra.gmra.mrb[0].mxu0 %v3217_v18  ;;  %v2268_v11 = vpack.c.bf16 %v754_v1, %v746_v55  ;;  %v818_v32 = vld [vmem:[#allocation8 + $0x4f8] sm:$0xff]  ;;  %v817_v55 = vld [vmem:[#allocation8 + $0x4f0] sm:$0xff]  ;;  %v824_v1 = vld [vmem:[#allocation8 + $0x528] sm:$0xff] }
 0x165   :  { %1509 = vmatmul.mubr.f32.vlgmr.msra.gmra.mrb[0].mxu1 %v3217_v18  ;;  %1360 = vmatprep.mubr.f32.mxu0 %v3245_v14 }
 0x166   :  { %1514 = vmatprep.mubr.f32.mxu1 %v3245_v14  ;;  %2123 = vmatpush1.bf16.msra.mxu0 %v2122_v44  ;;  %v768_v44 = vld [vmem:[#allocation8 + $0x368] sm:$0xff] }
 0x167   :  { %2251 = vmatpush1.bf16.msra.mxu1 %v2250_v33  ;;  %2125 = vmatprep.subr.bf16.mxu0 %v2124_v31  ;;  %v762_v33 = vld [vmem:[#allocation8 + $0x338] sm:$0xff]  ;;  %v2270_v31 = vpack.c.bf16 %v753_v22, %v745_v28  ;;  %v2144_v9 = vpack.c.bf16 %v768_v44, %v760_v56  ;;  %v831_v28 = vld [vmem:[#allocation8 + $0x560] sm:$0xff]  ;;  %v825_v44 = vld [vmem:[#allocation8 + $0x530] sm:$0xff] }
 0x168   :  { %2253 = vmatprep.subr.bf16.mxu1 %v2252_v54  ;;  %1361 = vmatmul.mubr.f32.gmra.mrb[2].mxu0 %v3264_v25  ;;  %v759_v54 = vld [vmem:[#allocation8 + $0x320] sm:$0xff]  ;;  %v2272_v13 = vpack.c.bf16 %v770_v40, %v762_v33  ;;  %v833_v33 = vld [vmem:[#allocation8 + $0x570] sm:$0xff]  ;;  %v840_v40 = vld [vmem:[#allocation8 + $0x5a8] sm:$0xff] }
 0x169   :  { %1515 = vmatmul.mubr.f32.gmra.mrb[2].mxu1 %v3264_v25  ;;  %1585 = vmatprep.mubr.f32.mxu0 %v3070_v2  ;;  %v2146_v51 = vpack.c.bf16 %v767_v7, %v759_v54  ;;  %v850_v54 = vld [vmem:[#allocation8 + $0x5f8] sm:$0xff] }
 0x16a   :  { %1739 = vmatprep.mubr.f32.mxu1 %v3070_v2  ;;  %2127 = vmatpush1.bf16.msra.mxu0 %v2126_v41  ;;  %v2262_v2 = vpack.c.bf16 %v721_v4, %v713_v0  ;;  %v784_v41 = vld [vmem:[#allocation8 + $0x3e8] sm:$0xff]  ;;  %v799_v0 = vld [vmem:[#allocation8 + $0x460] sm:$0xff] }
 0x16b   :  { %2255 = vmatpush1.bf16.msra.mxu1 %v2254_v43  ;;  %2129 = vmatprep.subr.bf16.mxu0 %v2128_v45  ;;  %v778_v43 = vld [vmem:[#allocation8 + $0x3b8] sm:$0xff]  ;;  %v2274_v45 = vpack.c.bf16 %v769_v8, %v761_v20  ;;  %v2148_v23 = vpack.c.bf16 %v784_v41, %v776_v36  ;;  %v847_v20 = vld [vmem:[#allocation8 + $0x5e0] sm:$0xff]  ;;  %v841_v41 = vld [vmem:[#allocation8 + $0x5b0] sm:$0xff] }
 0x16c   :  { %2257 = vmatprep.subr.bf16.mxu1 %v2256_v34  ;;  %v775_v34 = vld [vmem:[#allocation8 + $0x3a0] sm:$0xff]  ;;  %v2276_v24 = vpack.c.bf16 %v786_v52, %v778_v43  ;;  %v849_v43 = vld [vmem:[#allocation8 + $0x5f0] sm:$0xff]  ;;  %v856_v52 = vld [vmem:[#allocation8 + $0x628] sm:$0xff] }
 0x16d   :  { %v2150_v60 = vpack.c.bf16 %v783_v58, %v775_v34  ;;  %v866_v34 = vld [vmem:[#allocation8 + $0x678] sm:$0xff] }
 0x16e   :  { %2131 = vmatpush1.bf16.msra.mxu0 %v2130_v17  ;;  %v800_v17 = vld [vmem:[#allocation8 + $0x468] sm:$0xff] }
 0x16f   :  { %2259 = vmatpush1.bf16.msra.mxu1 %v2258_v19  ;;  %2133 = vmatprep.subr.bf16.mxu0 %v2132_v61  ;;  %v794_v19 = vld [vmem:[#allocation8 + $0x438] sm:$0xff]  ;;  %v2278_v61 = vpack.c.bf16 %v785_v16, %v777_v35  ;;  %v2152_v4 = vpack.c.bf16 %v800_v17, %v792_v46  ;;  %v863_v35 = vld [vmem:[#allocation8 + $0x660] sm:$0xff]  ;;  %v857_v17 = vld [vmem:[#allocation8 + $0x630] sm:$0xff] }
 0x170   :  { %2261 = vmatprep.subr.bf16.mxu1 %v2260_v5  ;;  %v791_v5 = vld [vmem:[#allocation8 + $0x420] sm:$0xff]  ;;  %v2280_v42 = vpack.c.bf16 %v802_v57, %v794_v19  ;;  %v865_v19 = vld [vmem:[#allocation8 + $0x670] sm:$0xff]  ;;  %v872_v57 = vld [vmem:[#allocation8 + $0x6a8] sm:$0xff] }
 0x171   :  { %v2154_v27 = vpack.c.bf16 %v799_v0, %v791_v5  ;;  %v882_v5 = vld [vmem:[#allocation8 + $0x6f8] sm:$0xff] }
 0x172   :  { %2135 = vmatpush1.bf16.msra.mxu0 %v2134_v3  ;;  %v816_v3 = vld [vmem:[#allocation8 + $0x4e8] sm:$0xff] }
 0x173   :  { %2263 = vmatpush1.bf16.msra.mxu1 %v2262_v2  ;;  %2137 = vmatprep.subr.bf16.mxu0 %v2136_v10  ;;  %v810_v2 = vld [vmem:[#allocation8 + $0x4b8] sm:$0xff]  ;;  %v2282_v10 = vpack.c.bf16 %v801_v48, %v793_v29  ;;  %v2156_v38 = vpack.c.bf16 %v816_v3, %v808_v15  ;;  %v879_v29 = vld [vmem:[#allocation8 + $0x6e0] sm:$0xff]  ;;  %v873_v3 = vld [vmem:[#allocation8 + $0x6b0] sm:$0xff] }
 0x174   :  { %2265 = vmatprep.subr.bf16.mxu1 %v2264_v62  ;;  %v807_v62 = vld [vmem:[#allocation8 + $0x4a0] sm:$0xff]  ;;  %v2284_v63 = vpack.c.bf16 %v818_v32, %v810_v2  ;;  %v881_v2 = vld [vmem:[#allocation8 + $0x6f0] sm:$0xff]  ;;  %v888_v32 = vld [vmem:[#allocation8 + $0x728] sm:$0xff] }
 0x175   :  { %v2158_v50 = vpack.c.bf16 %v815_v21, %v807_v62  ;;  %v898_v62 = vld [vmem:[#allocation8 + $0x778] sm:$0xff] }
 0x176   :  { %2139 = vmatpush1.bf16.msra.mxu0 %v2138_v37  ;;  %v832_v37 = vld [vmem:[#allocation8 + $0x568] sm:$0xff] }
 0x177   :  { %2267 = vmatpush1.bf16.msra.mxu1 %v2266_v30  ;;  %2141 = vmatprep.subr.bf16.mxu0 %v2140_v26  ;;  %v826_v30 = vld [vmem:[#allocation8 + $0x538] sm:$0xff]  ;;  %v2286_v26 = vpack.c.bf16 %v817_v55, %v809_v6  ;;  %v2160_v22 = vpack.c.bf16 %v832_v37, %v824_v1  ;;  %v895_v6 = vld [vmem:[#allocation8 + $0x760] sm:$0xff]  ;;  %v889_v37 = vld [vmem:[#allocation8 + $0x730] sm:$0xff] }
 0x178   :  { %2269 = vmatprep.subr.bf16.mxu1 %v2268_v11  ;;  %v823_v11 = vld [vmem:[#allocation8 + $0x520] sm:$0xff]  ;;  %v2288_v56 = vpack.c.bf16 %v834_v59, %v826_v30  ;;  %v897_v30 = vld [vmem:[#allocation8 + $0x770] sm:$0xff]  ;;  %v904_v59 = vld [vmem:[#allocation8 + $0x7a8] sm:$0xff] }
 0x179   :  { %v2162_v7 = vpack.c.bf16 %v831_v28, %v823_v11  ;;  %v914_v11 = vld [vmem:[#allocation8 + $0x7f8] sm:$0xff] }
 0x17a   :  { %2143 = vmatpush1.bf16.msra.mxu0 %v2142_v12  ;;  %v848_v12 = vld [vmem:[#allocation8 + $0x5e8] sm:$0xff] }
 0x17b   :  { %2271 = vmatpush1.bf16.msra.mxu1 %v2270_v31  ;;  %2145 = vmatprep.subr.bf16.mxu0 %v2144_v9  ;;  %v842_v31 = vld [vmem:[#allocation8 + $0x5b8] sm:$0xff]  ;;  %v2290_v9 = vpack.c.bf16 %v833_v33, %v825_v44  ;;  %v2164_v8 = vpack.c.bf16 %v848_v12, %v840_v40  ;;  %v911_v44 = vld [vmem:[#allocation8 + $0x7e0] sm:$0xff]  ;;  %v905_v12 = vld [vmem:[#allocation8 + $0x7b0] sm:$0xff] }
 0x17c   :  { %2273 = vmatprep.subr.bf16.mxu1 %v2272_v13  ;;  %v839_v13 = vld [vmem:[#allocation8 + $0x5a0] sm:$0xff]  ;;  %v2292_v36 = vpack.c.bf16 %v850_v54, %v842_v31  ;;  %v913_v31 = vld [vmem:[#allocation8 + $0x7f0] sm:$0xff]  ;;  %v920_v54 = vld [vmem:[#allocation8 + $0x828] sm:$0xff] }
 0x17d   :  { %v2166_v58 = vpack.c.bf16 %v847_v20, %v839_v13  ;;  %v930_v13 = vld [vmem:[#allocation8 + $0x878] sm:$0xff] }
 0x17e   :  { %2147 = vmatpush1.bf16.msra.mxu0 %v2146_v51  ;;  %v864_v51 = vld [vmem:[#allocation8 + $0x668] sm:$0xff] }
 0x17f   :  { %2275 = vmatpush1.bf16.msra.mxu1 %v2274_v45  ;;  %2149 = vmatprep.subr.bf16.mxu0 %v2148_v23  ;;  %v858_v45 = vld [vmem:[#allocation8 + $0x638] sm:$0xff]  ;;  %v2294_v23 = vpack.c.bf16 %v849_v43, %v841_v41  ;;  %v2168_v16 = vpack.c.bf16 %v864_v51, %v856_v52  ;;  %v919_v43 = vld [vmem:[#allocation8 + $0x820] sm:$0xff]  ;;  %v921_v51 = vld [vmem:[#allocation8 + $0x830] sm:$0xff] }
 0x180   :  { %2277 = vmatprep.subr.bf16.mxu1 %v2276_v24  ;;  %v855_v24 = vld [vmem:[#allocation8 + $0x620] sm:$0xff]  ;;  %v2296_v46 = vpack.c.bf16 %v866_v34, %v858_v45  ;;  %v929_v45 = vld [vmem:[#allocation8 + $0x870] sm:$0xff]  ;;  %v936_v34 = vld [vmem:[#allocation8 + $0x8a8] sm:$0xff] }
 0x181   :  { %v2170_v0 = vpack.c.bf16 %v863_v35, %v855_v24  ;;  %v927_v52 = vld [vmem:[#allocation8 + $0x860] sm:$0xff]  ;;  %v946_v24 = vld [vmem:[#allocation8 + $0x8f8] sm:$0xff] }
 0x182   :  { %2151 = vmatpush1.bf16.msra.mxu0 %v2150_v60  ;;  %v880_v60 = vld [vmem:[#allocation8 + $0x6e8] sm:$0xff]  ;;  %v2186_v35 = vpack.c.bf16 %v927_v52, %v919_v43  ;;  %v1001_v43 = vld [vmem:[#allocation8 + $0xab0] sm:$0xff] }
 0x183   :  { %2279 = vmatpush1.bf16.msra.mxu1 %v2278_v61  ;;  %2153 = vmatprep.subr.bf16.mxu0 %v2152_v4  ;;  %v874_v61 = vld [vmem:[#allocation8 + $0x6b8] sm:$0xff]  ;;  %v2298_v4 = vpack.c.bf16 %v865_v19, %v857_v17  ;;  %v2172_v48 = vpack.c.bf16 %v880_v60, %v872_v57  ;;  %v943_v17 = vld [vmem:[#allocation8 + $0x8e0] sm:$0xff]  ;;  %v937_v60 = vld [vmem:[#allocation8 + $0x8b0] sm:$0xff] }
 0x184   :  { %2281 = vmatprep.subr.bf16.mxu1 %v2280_v42  ;;  %v871_v42 = vld [vmem:[#allocation8 + $0x6a0] sm:$0xff]  ;;  %v2300_v15 = vpack.c.bf16 %v882_v5, %v874_v61  ;;  %v945_v61 = vld [vmem:[#allocation8 + $0x8f0] sm:$0xff]  ;;  %v952_v5 = vld [vmem:[#allocation8 + $0x928] sm:$0xff] }
 0x185   :  { %v2174_v21 = vpack.c.bf16 %v879_v29, %v871_v42  ;;  %v962_v42 = vld [vmem:[#allocation8 + $0x978] sm:$0xff] }
 0x186   :  { %2155 = vmatpush1.bf16.msra.mxu0 %v2154_v27  ;;  %v896_v27 = vld [vmem:[#allocation8 + $0x768] sm:$0xff] }
 0x187   :  { %2283 = vmatpush1.bf16.msra.mxu1 %v2282_v10  ;;  %2157 = vmatprep.subr.bf16.mxu0 %v2156_v38  ;;  %v890_v10 = vld [vmem:[#allocation8 + $0x738] sm:$0xff]  ;;  %v2302_v38 = vpack.c.bf16 %v881_v2, %v873_v3  ;;  %v2176_v55 = vpack.c.bf16 %v896_v27, %v888_v32  ;;  %v959_v3 = vld [vmem:[#allocation8 + $0x960] sm:$0xff]  ;;  %v953_v2 = vld [vmem:[#allocation8 + $0x930] sm:$0xff] }
 0x188   :  { %2285 = vmatprep.subr.bf16.mxu1 %v2284_v63  ;;  %v887_v63 = vld [vmem:[#allocation8 + $0x720] sm:$0xff]  ;;  %v2304_v1 = vpack.c.bf16 %v898_v62, %v890_v10  ;;  %v961_v10 = vld [vmem:[#allocation8 + $0x970] sm:$0xff]  ;;  %v976_v62 = vld [vmem:[#allocation8 + $0x9e8] sm:$0xff] }
 0x189   :  { %v2178_v28 = vpack.c.bf16 %v895_v6, %v887_v63  ;;  %v2322_v63 = vpack.c.bf16 %v961_v10, %v953_v2  ;;  %v1033_v2 = vld [vmem:[#allocation8 + $0xbb0] sm:$0xff]  ;;  %v1048_v10 = vld [vmem:[#allocation8 + $0xc28] sm:$0xff] }
 0x18a   :  { %2159 = vmatpush1.bf16.msra.mxu0 %v2158_v50  ;;  %v912_v50 = vld [vmem:[#allocation8 + $0x7e8] sm:$0xff] }
 0x18b   :  { %2287 = vmatpush1.bf16.msra.mxu1 %v2286_v26  ;;  %2161 = vmatprep.subr.bf16.mxu0 %v2160_v22  ;;  %v906_v26 = vld [vmem:[#allocation8 + $0x7b8] sm:$0xff]  ;;  %v2306_v22 = vpack.c.bf16 %v897_v30, %v889_v37  ;;  %v2180_v33 = vpack.c.bf16 %v912_v50, %v904_v59  ;;  %v969_v37 = vld [vmem:[#allocation8 + $0x9b0] sm:$0xff]  ;;  %v984_v50 = vld [vmem:[#allocation8 + $0xa28] sm:$0xff] }
 0x18c   :  { %2289 = vmatprep.subr.bf16.mxu1 %v2288_v56  ;;  %v903_v56 = vld [vmem:[#allocation8 + $0x7a0] sm:$0xff]  ;;  %v2308_v40 = vpack.c.bf16 %v914_v11, %v906_v26  ;;  %v977_v59 = vld [vmem:[#allocation8 + $0x9f0] sm:$0xff]  ;;  %v986_v26 = vld [vmem:[#allocation8 + $0xa38] sm:$0xff] }
 0x18d   :  { %v2182_v20 = vpack.c.bf16 %v911_v44, %v903_v56  ;;  %v994_v11 = vld [vmem:[#allocation8 + $0xa78] sm:$0xff]  ;;  %v991_v44 = vld [vmem:[#allocation8 + $0xa60] sm:$0xff] }
 0x18e   :  { %2163 = vmatpush1.bf16.msra.mxu0 %v2162_v7  ;;  %v928_v7 = vld [vmem:[#allocation8 + $0x868] sm:$0xff] }
 0x18f   :  { %2291 = vmatpush1.bf16.msra.mxu1 %v2290_v9  ;;  %2165 = vmatprep.subr.bf16.mxu0 %v2164_v8  ;;  %v922_v9 = vld [vmem:[#allocation8 + $0x838] sm:$0xff]  ;;  %v2310_v8 = vpack.c.bf16 %v913_v31, %v905_v12  ;;  %v993_v12 = vld [vmem:[#allocation8 + $0xa70] sm:$0xff]  ;;  %v1000_v31 = vld [vmem:[#allocation8 + $0xaa8] sm:$0xff] }
 0x190   :  { %2293 = vmatprep.subr.bf16.mxu1 %v2292_v36  ;;  %v2184_v36 = vpack.c.bf16 %v928_v7, %v920_v54  ;;  %v2312_v41 = vpack.c.bf16 %v930_v13, %v922_v9  ;;  %v1008_v54 = vld [vmem:[#allocation8 + $0xae8] sm:$0xff]  ;;  %v1002_v7 = vld [vmem:[#allocation8 + $0xab8] sm:$0xff] }
 0x191   :  { %v1010_v9 = vld [vmem:[#allocation8 + $0xaf8] sm:$0xff] }
 0x192   :  { %2167 = vmatpush1.bf16.msra.mxu0 %v2166_v58  ;;  %v944_v58 = vld [vmem:[#allocation8 + $0x8e8] sm:$0xff]  ;;  %v2332_v52 = vpack.c.bf16 %v1010_v9, %v1002_v7  ;;  %v1090_v7 = vld [vmem:[#allocation8 + $0xd78] sm:$0xff] }
 0x193   :  { %2295 = vmatpush1.bf16.msra.mxu1 %v2294_v23  ;;  %2169 = vmatprep.subr.bf16.mxu0 %v2168_v16  ;;  %v938_v23 = vld [vmem:[#allocation8 + $0x8b8] sm:$0xff]  ;;  %v2314_v16 = vpack.c.bf16 %v929_v45, %v921_v51  ;;  %v2188_v19 = vpack.c.bf16 %v944_v58, %v936_v34  ;;  %v1009_v51 = vld [vmem:[#allocation8 + $0xaf0] sm:$0xff]  ;;  %v1016_v45 = vld [vmem:[#allocation8 + $0xb28] sm:$0xff] }
 0x194   :  { %2297 = vmatprep.subr.bf16.mxu1 %v2296_v46  ;;  %v935_v46 = vld [vmem:[#allocation8 + $0x8a0] sm:$0xff]  ;;  %v2316_v57 = vpack.c.bf16 %v946_v24, %v938_v23  ;;  %v1024_v34 = vld [vmem:[#allocation8 + $0xb68] sm:$0xff]  ;;  %v1018_v58 = vld [vmem:[#allocation8 + $0xb38] sm:$0xff] }
 0x195   :  { %v2190_v29 = vpack.c.bf16 %v943_v17, %v935_v46  ;;  %v1026_v23 = vld [vmem:[#allocation8 + $0xb78] sm:$0xff]  ;;  %v1015_v46 = vld [vmem:[#allocation8 + $0xb20] sm:$0xff] }
 0x196   :  { %2171 = vmatpush1.bf16.msra.mxu0 %v2170_v0  ;;  %v960_v0 = vld [vmem:[#allocation8 + $0x968] sm:$0xff]  ;;  %v1023_v17 = vld [vmem:[#allocation8 + $0xb60] sm:$0xff] }
 0x197   :  { %2299 = vmatpush1.bf16.msra.mxu1 %v2298_v4  ;;  %2173 = vmatprep.subr.bf16.mxu0 %v2172_v48  ;;  %v954_v4 = vld [vmem:[#allocation8 + $0x938] sm:$0xff]  ;;  %v2318_v48 = vpack.c.bf16 %v945_v61, %v937_v60  ;;  %v2192_v32 = vpack.c.bf16 %v960_v0, %v952_v5  ;;  %v1025_v60 = vld [vmem:[#allocation8 + $0xb70] sm:$0xff]  ;;  %v1032_v61 = vld [vmem:[#allocation8 + $0xba8] sm:$0xff] }
 0x198   :  { %2301 = vmatprep.subr.bf16.mxu1 %v2300_v15  ;;  %v951_v15 = vld [vmem:[#allocation8 + $0x920] sm:$0xff]  ;;  %v2320_v27 = vpack.c.bf16 %v962_v42, %v954_v4  ;;  %v1040_v5 = vld [vmem:[#allocation8 + $0xbe8] sm:$0xff]  ;;  %v1034_v0 = vld [vmem:[#allocation8 + $0xbb8] sm:$0xff]  ;;  %v2210_v42 = vpack.c.bf16 %v1023_v17, %v1015_v46 }
 0x199   :  { %v1042_v4 = vld [vmem:[#allocation8 + $0xbf8] sm:$0xff]  ;;  %v1103_v46 = vld [vmem:[#allocation8 + $0xde0] sm:$0xff]  ;;  %v1097_v17 = vld [vmem:[#allocation8 + $0xdb0] sm:$0xff] }
 0x19a   :  { %2175 = vmatpush1.bf16.msra.mxu0 %v2174_v21  ;;  %v970_v21 = vld [vmem:[#allocation8 + $0x9b8] sm:$0xff] }
 0x19b   :  { %2303 = vmatpush1.bf16.msra.mxu1 %v2302_v38  ;;  %2177 = vmatprep.subr.bf16.mxu0 %v2176_v55  ;;  %v978_v38 = vld [vmem:[#allocation8 + $0x9f8] sm:$0xff]  ;;  %v967_v55 = vld [vmem:[#allocation8 + $0x9a0] sm:$0xff] }
 0x19c   :  { %2305 = vmatprep.subr.bf16.mxu1 %v2304_v1  ;;  %v975_v1 = vld [vmem:[#allocation8 + $0x9e0] sm:$0xff]  ;;  %v2324_v30 = vpack.c.bf16 %v978_v38, %v970_v21  ;;  %v1058_v21 = vld [vmem:[#allocation8 + $0xc78] sm:$0xff] }
 0x19e   :  { %2179 = vmatpush1.bf16.msra.mxu0 %v2178_v28  ;;  %v2198_v28 = vpack.c.bf16 %v975_v1, %v967_v55  ;;  %v1055_v55 = vld [vmem:[#allocation8 + $0xc60] sm:$0xff]  ;;  %v1049_v1 = vld [vmem:[#allocation8 + $0xc30] sm:$0xff] }
 0x19f   :  { %2307 = vmatpush1.bf16.msra.mxu1 %v2306_v22  ;;  %2181 = vmatprep.subr.bf16.mxu0 %v2180_v33  ;;  %v2326_v22 = vpack.c.bf16 %v977_v59, %v969_v37  ;;  %v985_v33 = vld [vmem:[#allocation8 + $0xa30] sm:$0xff]  ;;  %v1064_v59 = vld [vmem:[#allocation8 + $0xca8] sm:$0xff] }
 0x1a0   :  { %2309 = vmatprep.subr.bf16.mxu1 %v2308_v40  ;;  %v2328_v40 = vpack.c.bf16 %v994_v11, %v986_v26  ;;  %v1074_v26 = vld [vmem:[#allocation8 + $0xcf8] sm:$0xff] }
 0x1a2   :  { %2183 = vmatpush1.bf16.msra.mxu0 %v2182_v20  ;;  %v2330_v20 = vpack.c.bf16 %v993_v12, %v985_v33  ;;  %v1080_v12 = vld [vmem:[#allocation8 + $0xd28] sm:$0xff] }
 0x1a3   :  { %2311 = vmatpush1.bf16.msra.mxu1 %v2310_v8  ;;  %2185 = vmatprep.subr.bf16.mxu0 %v2184_v36  ;;  %v2204_v8 = vpack.c.bf16 %v1008_v54, %v1000_v31  ;;  %v999_v36 = vld [vmem:[#allocation8 + $0xaa0] sm:$0xff]  ;;  %v1088_v31 = vld [vmem:[#allocation8 + $0xd68] sm:$0xff]  ;;  %v1082_v54 = vld [vmem:[#allocation8 + $0xd38] sm:$0xff] }
 0x1a4   :  { %2313 = vmatprep.subr.bf16.mxu1 %v2312_v41  ;;  %v1007_v41 = vld [vmem:[#allocation8 + $0xae0] sm:$0xff] }
 0x1a5   :  { %1586 = vmatmul.mubr.f32.vlgmr.msra.gmra.mrb[4].mxu0 %v3082_v53  ;;  %v2206_v24 = vpack.c.bf16 %v1007_v41, %v999_v36  ;;  %v1087_v36 = vld [vmem:[#allocation8 + $0xd60] sm:$0xff]  ;;  %v1081_v41 = vld [vmem:[#allocation8 + $0xd30] sm:$0xff] }
 0x1a6   :  { %1740 = vmatmul.mubr.f32.vlgmr.msra.gmra.mrb[4].mxu1 %v3082_v53  ;;  %1591 = vmatprep.mubr.f32.mxu0 %v3109_v39  ;;  %v968_v53 = vld [vmem:[#allocation8 + $0x9a8] sm:$0xff] }
 0x1a7   :  { %2187 = vmatpush1.bf16.msra.mxu0 %v2186_v35  ;;  %1745 = vmatprep.mubr.f32.mxu1 %v3109_v39  ;;  %v2194_v39 = vpack.c.bf16 %v959_v3, %v951_v15  ;;  %v2196_v6 = vpack.c.bf16 %v976_v62, %v968_v53  ;;  %v2334_v35 = vpack.c.bf16 %v1009_v51, %v1001_v43  ;;  %v1031_v15 = vld [vmem:[#allocation8 + $0xba0] sm:$0xff]  ;;  %v1056_v53 = vld [vmem:[#allocation8 + $0xc68] sm:$0xff]  ;;  %v1050_v62 = vld [vmem:[#allocation8 + $0xc38] sm:$0xff] }
 0x1a8   :  { %2315 = vmatpush1.bf16.msra.mxu1 %v2314_v16  ;;  %2189 = vmatprep.subr.bf16.mxu0 %v2188_v19  ;;  %v2208_v16 = vpack.c.bf16 %v1024_v34, %v1016_v45  ;;  %v1017_v19 = vld [vmem:[#allocation8 + $0xb30] sm:$0xff]  ;;  %v1039_v3 = vld [vmem:[#allocation8 + $0xbe0] sm:$0xff]  ;;  %v2344_v37 = vpack.c.bf16 %v1058_v21, %v1050_v62  ;;  %v2352_v43 = vpack.c.bf16 %v1090_v7, %v1082_v54  ;;  %v1096_v51 = vld [vmem:[#allocation8 + $0xda8] sm:$0xff] }
 0x1a9   :  { %2317 = vmatprep.subr.bf16.mxu1 %v2316_v57  ;;  %1592 = vmatmul.mubr.f32.gmra.mrb[6].mxu0 %v3163_v49  ;;  %v2336_v57 = vpack.c.bf16 %v1026_v23, %v1018_v58  ;;  %v2214_v38 = vpack.c.bf16 %v1039_v3, %v1031_v15  ;;  %v1104_v45 = vld [vmem:[#allocation8 + $0xde8] sm:$0xff]  ;;  %v1098_v34 = vld [vmem:[#allocation8 + $0xdb8] sm:$0xff]  ;;  %v1119_v15 = vld [vmem:[#allocation8 + $0xe60] sm:$0xff] }
 0x1aa   :  { %1746 = vmatmul.mubr.f32.gmra.mrb[6].mxu1 %v3163_v49  ;;  %1662 = vmatprep.mubr.f32.mxu0 %v3176_v47  ;;  %v992_v49 = vld [vmem:[#allocation8 + $0xa68] sm:$0xff]  ;;  %v1106_v58 = vld [vmem:[#allocation8 + $0xdf8] sm:$0xff]  ;;  %v1113_v3 = vld [vmem:[#allocation8 + $0xe30] sm:$0xff] }
 0x1ab   :  { %2191 = vmatpush1.bf16.msra.mxu0 %v2190_v29  ;;  %1816 = vmatprep.mubr.f32.mxu1 %v3176_v47  ;;  %v2200_v56 = vpack.c.bf16 %v992_v49, %v984_v50  ;;  %v983_v47 = vld [vmem:[#allocation8 + $0xa20] sm:$0xff]  ;;  %v2338_v29 = vpack.c.bf16 %v1025_v60, %v1017_v19  ;;  %v1072_v50 = vld [vmem:[#allocation8 + $0xce8] sm:$0xff]  ;;  %v1066_v49 = vld [vmem:[#allocation8 + $0xcb8] sm:$0xff]  ;;  %v2356_v19 = vpack.c.bf16 %v1106_v58, %v1098_v34 }
 0x1ac   :  { %2319 = vmatpush1.bf16.msra.mxu1 %v2318_v48  ;;  %2193 = vmatprep.subr.bf16.mxu0 %v2192_v32  ;;  %v2202_v13 = vpack.c.bf16 %v991_v44, %v983_v47  ;;  %v2212_v48 = vpack.c.bf16 %v1040_v5, %v1032_v61  ;;  %v2340_v32 = vpack.c.bf16 %v1042_v4, %v1034_v0  ;;  %v1071_v47 = vld [vmem:[#allocation8 + $0xce0] sm:$0xff]  ;;  %v1065_v44 = vld [vmem:[#allocation8 + $0xcb0] sm:$0xff]  ;;  %v1112_v60 = vld [vmem:[#allocation8 + $0xe28] sm:$0xff] }
 0x1ad   :  { %2321 = vmatprep.subr.bf16.mxu1 %v2320_v27  ;;  %v1041_v27 = vld [vmem:[#allocation8 + $0xbf0] sm:$0xff]  ;;  %v2348_v33 = vpack.c.bf16 %v1074_v26, %v1066_v49  ;;  %v1120_v61 = vld [vmem:[#allocation8 + $0xe68] sm:$0xff]  ;;  %v1114_v5 = vld [vmem:[#allocation8 + $0xe38] sm:$0xff] }
 0x1ae   :  { %v1122_v0 = vld [vmem:[#allocation8 + $0xe78] sm:$0xff]  ;;  %v3529_v34 = vld [vmem:[#allocation16_spill] sm:$0xff] }
 0x1af   :  { %2195 = vmatpush1.bf16.msra.mxu0 %v2194_v39  ;;  %v2342_v39 = vpack.c.bf16 %v1041_v27, %v1033_v2  ;;  %v2360_v2 = vpack.c.bf16 %v1122_v0, %v1114_v5  ;;  %v1128_v27 = vld [vmem:[#allocation8 + $0xea8] sm:$0xff]  ;;  %v1138_v62 = vld [vmem:[#allocation8 + $0xef8] sm:$0xff]  ;;  %v3530_v58 = vsub.s32 0, %v3529_v34 }
 0x1b0   :  { %2323 = vmatpush1.bf16.msra.mxu1 %v2322_v63  ;;  %2197 = vmatprep.subr.bf16.mxu0 %v2196_v6  ;;  %v2216_v63 = vpack.c.bf16 %v1056_v53, %v1048_v10  ;;  %v1047_v6 = vld [vmem:[#allocation8 + $0xc20] sm:$0xff]  ;;  %v1136_v10 = vld [vmem:[#allocation8 + $0xee8] sm:$0xff]  ;;  %v1130_v53 = vld [vmem:[#allocation8 + $0xeb8] sm:$0xff] }
 0x1b1   :  { %2325 = vmatprep.subr.bf16.mxu1 %v2324_v30  ;;  %v1057_v30 = vld [vmem:[#allocation8 + $0xc70] sm:$0xff]  ;;  %v2218_v11 = vpack.c.bf16 %v1055_v55, %v1047_v6  ;;  %v1135_v6 = vld [vmem:[#allocation8 + $0xee0] sm:$0xff]  ;;  %v1154_v49 = vld [vmem:[#allocation8 + $0xf78] sm:$0xff] }
 0x1b2   :  { %v1129_v55 = vld [vmem:[#allocation8 + $0xeb0] sm:$0xff]  ;;  %v1170_v54 = vld [vmem:[#allocation8 + $0xff8] sm:$0xff] }
 0x1b3   :  { %2199 = vmatpush1.bf16.msra.mxu0 %v2198_v28  ;;  %v2346_v28 = vpack.c.bf16 %v1057_v30, %v1049_v1  ;;  %v2364_v1 = vpack.c.bf16 %v1138_v62, %v1130_v53  ;;  %v1144_v30 = vld [vmem:[#allocation8 + $0xf28] sm:$0xff]  ;;  %v3535_v53 = vsub.s32 6, %v3529_v34 }
 0x1b4   :  { %2327 = vmatpush1.bf16.msra.mxu1 %v2326_v22  ;;  %2201 = vmatprep.subr.bf16.mxu0 %v2200_v56  ;;  %v2220_v22 = vpack.c.bf16 %v1072_v50, %v1064_v59  ;;  %v1063_v56 = vld [vmem:[#allocation8 + $0xca0] sm:$0xff]  ;;  %v1152_v59 = vld [vmem:[#allocation8 + $0xf68] sm:$0xff]  ;;  %v1146_v50 = vld [vmem:[#allocation8 + $0xf38] sm:$0xff] }
 0x1b5   :  { %2329 = vmatprep.subr.bf16.mxu1 %v2328_v40  ;;  %v1073_v40 = vld [vmem:[#allocation8 + $0xcf0] sm:$0xff]  ;;  %v2222_v9 = vpack.c.bf16 %v1071_v47, %v1063_v56  ;;  %v1151_v56 = vld [vmem:[#allocation8 + $0xf60] sm:$0xff] }
 0x1b6   :  { %v1145_v47 = vld [vmem:[#allocation8 + $0xf30] sm:$0xff] }
 0x1b7   :  { %2203 = vmatpush1.bf16.msra.mxu0 %v2202_v13  ;;  %v2350_v13 = vpack.c.bf16 %v1073_v40, %v1065_v44  ;;  %v2368_v44 = vpack.c.bf16 %v1154_v49, %v1146_v50  ;;  %v1160_v40 = vld [vmem:[#allocation8 + $0xfa8] sm:$0xff] }
 0x1b8   :  { %2331 = vmatpush1.bf16.msra.mxu1 %v2330_v20  ;;  %2205 = vmatprep.subr.bf16.mxu0 %v2204_v8  ;;  %v2224_v20 = vpack.c.bf16 %v1088_v31, %v1080_v12  ;;  %v1079_v8 = vld [vmem:[#allocation8 + $0xd20] sm:$0xff]  ;;  %v1168_v12 = vld [vmem:[#allocation8 + $0xfe8] sm:$0xff]  ;;  %v1162_v31 = vld [vmem:[#allocation8 + $0xfb8] sm:$0xff] }
 0x1b9   :  { %2333 = vmatprep.subr.bf16.mxu1 %v2332_v52  ;;  %v1089_v52 = vld [vmem:[#allocation8 + $0xd70] sm:$0xff]  ;;  %v2226_v23 = vpack.c.bf16 %v1087_v36, %v1079_v8  ;;  %v1167_v8 = vld [vmem:[#allocation8 + $0xfe0] sm:$0xff]  ;;  %v2372_v36 = vpack.c.bf16 %v1170_v54, %v1162_v31 }
 0x1bb   :  { %2207 = vmatpush1.bf16.msra.mxu0 %v2206_v24  ;;  %v2354_v24 = vpack.c.bf16 %v1089_v52, %v1081_v41  ;;  %v1161_v41 = vld [vmem:[#allocation8 + $0xfb0] sm:$0xff] }
 0x1bc   :  { %2335 = vmatpush1.bf16.msra.mxu1 %v2334_v35  ;;  %2209 = vmatprep.subr.bf16.mxu0 %v2208_v16  ;;  %v2228_v35 = vpack.c.bf16 %v1104_v45, %v1096_v51  ;;  %v1095_v16 = vld [vmem:[#allocation8 + $0xda0] sm:$0xff] }
 0x1bd   :  { %2337 = vmatprep.subr.bf16.mxu1 %v2336_v57  ;;  %v1105_v57 = vld [vmem:[#allocation8 + $0xdf0] sm:$0xff]  ;;  %v2230_v4 = vpack.c.bf16 %v1103_v46, %v1095_v16  ;;  %v1171_v45 = vld [vmem:[#allocation10] sm:$0xff]  ;;  %v3532_v16 = vsub.s32 1, %v3529_v34 }
 0x1be   :  { %v1200_v62 = vrot.slane %v1171_v45, %v3535_v53 }
 0x1bf   :  { %2211 = vmatpush1.bf16.msra.mxu0 %v2210_v42  ;;  %v2358_v42 = vpack.c.bf16 %v1105_v57, %v1097_v17  ;;  %v1180_v46 = vrot.slane %v1171_v45, %v3532_v16 }
 0x1c0   :  { %2339 = vmatpush1.bf16.msra.mxu1 %v2338_v29  ;;  %2213 = vmatprep.subr.bf16.mxu0 %v2212_v48  ;;  %v2232_v29 = vpack.c.bf16 %v1120_v61, %v1112_v60  ;;  %v1111_v48 = vld [vmem:[#allocation8 + $0xe20] sm:$0xff] }
 0x1c1   :  { %2341 = vmatprep.subr.bf16.mxu1 %v2340_v32  ;;  %v1121_v32 = vld [vmem:[#allocation8 + $0xe70] sm:$0xff]  ;;  %v2234_v21 = vpack.c.bf16 %v1119_v15, %v1111_v48 }
 0x1c3   :  { %2215 = vmatpush1.bf16.msra.mxu0 %v2214_v38  ;;  %v2362_v38 = vpack.c.bf16 %v1121_v32, %v1113_v3 }
 0x1c4   :  { %2343 = vmatpush1.bf16.msra.mxu1 %v2342_v39  ;;  %2217 = vmatprep.subr.bf16.mxu0 %v2216_v63  ;;  %v2236_v39 = vpack.c.bf16 %v1136_v10, %v1128_v27  ;;  %v1127_v63 = vld [vmem:[#allocation8 + $0xea0] sm:$0xff]  ;;  %v3534_v27 = vsub.s32 4, %v3529_v34 }
 0x1c5   :  { %2345 = vmatprep.subr.bf16.mxu1 %v2344_v37  ;;  %v1137_v37 = vld [vmem:[#allocation8 + $0xef0] sm:$0xff]  ;;  %v2238_v26 = vpack.c.bf16 %v1135_v6, %v1127_v63 }
 0x1c6   :  { %v1192_v10 = vrot.slane %v1171_v45, %v3534_v27 }
 0x1c7   :  { %2219 = vmatpush1.bf16.msra.mxu0 %v2218_v11  ;;  %v2366_v11 = vpack.c.bf16 %v1137_v37, %v1129_v55 }
 0x1c8   :  { %2347 = vmatpush1.bf16.msra.mxu1 %v2346_v28  ;;  %2221 = vmatprep.subr.bf16.mxu0 %v2220_v22  ;;  %v2240_v28 = vpack.c.bf16 %v1152_v59, %v1144_v30  ;;  %v1143_v22 = vld [vmem:[#allocation8 + $0xf20] sm:$0xff] }
 0x1c9   :  { %2349 = vmatprep.subr.bf16.mxu1 %v2348_v33  ;;  %v1153_v33 = vld [vmem:[#allocation8 + $0xf70] sm:$0xff]  ;;  %v2242_v7 = vpack.c.bf16 %v1151_v56, %v1143_v22 }
 0x1cb   :  { %2223 = vmatpush1.bf16.msra.mxu0 %v2222_v9  ;;  %v2370_v9 = vpack.c.bf16 %v1153_v33, %v1145_v47 }
 0x1cc   :  { %2351 = vmatpush1.bf16.msra.mxu1 %v2350_v13  ;;  %2225 = vmatprep.subr.bf16.mxu0 %v2224_v20  ;;  %v2244_v13 = vpack.c.bf16 %v1168_v12, %v1160_v40  ;;  %v1159_v20 = vld [vmem:[#allocation8 + $0xfa0] sm:$0xff] }
 0x1cd   :  { %2353 = vmatprep.subr.bf16.mxu1 %v2352_v43  ;;  %v1169_v43 = vld [vmem:[#allocation8 + $0xff0] sm:$0xff]  ;;  %v2246_v52 = vpack.c.bf16 %v1167_v8, %v1159_v20 }
 0x1ce   :  { %v2374_v51 = vpack.c.bf16 %v1169_v43, %v1161_v41 }
 0x1cf   :  { %2227 = vmatpush1.bf16.msra.mxu0 %v2226_v23  ;;  %v1176_v23 = vrot.slane %v1171_v45, %v3530_v58 }
 0x1d0   :  { %2355 = vmatpush1.bf16.msra.mxu1 %v2354_v24  ;;  %2229 = vmatprep.subr.bf16.mxu0 %v2228_v35  ;;  %v3531_v24 = vsub.s32 2, %v3529_v34 }
 0x1d1   :  { %2357 = vmatprep.subr.bf16.mxu1 %v2356_v19 }
 0x1d2   :  { %v1184_v35 = vrot.slane %v1171_v45, %v3531_v24 }
 0x1d3   :  { %2231 = vmatpush1.bf16.msra.mxu0 %v2230_v4 }
 0x1d4   :  { %2359 = vmatpush1.bf16.msra.mxu1 %v2358_v42  ;;  %2233 = vmatprep.subr.bf16.mxu0 %v2232_v29 }
 0x1d5   :  { %2361 = vmatprep.subr.bf16.mxu1 %v2360_v2 }
 0x1d7   :  { %2235 = vmatpush1.bf16.msra.mxu0 %v2234_v21  ;;  %v3536_v21 = vsub.s32 5, %v3529_v34 }
 0x1d8   :  { %2363 = vmatpush1.bf16.msra.mxu1 %v2362_v38  ;;  %2237 = vmatprep.subr.bf16.mxu0 %v2236_v39  ;;  %v3537_v39 = vsub.s32 7, %v3529_v34 }
 0x1d9   :  { %2365 = vmatprep.subr.bf16.mxu1 %v2364_v1  ;;  %v1196_v38 = vrot.slane %v1171_v45, %v3536_v21 }
 0x1da   :  { %v1204_v63 = vrot.slane %v1171_v45, %v3537_v39 }
 0x1db   :  { %2239 = vmatpush1.bf16.msra.mxu0 %v2238_v26 }
 0x1dc   :  { %2367 = vmatpush1.bf16.msra.mxu1 %v2366_v11  ;;  %2241 = vmatprep.subr.bf16.mxu0 %v2240_v28 }
 0x1dd   :  { %2369 = vmatprep.subr.bf16.mxu1 %v2368_v44 }
 0x1df   :  { %2243 = vmatpush1.bf16.msra.mxu0 %v2242_v7 }
 0x1e0   :  { %2371 = vmatpush1.bf16.msra.mxu1 %v2370_v9  ;;  %2245 = vmatprep.subr.bf16.mxu0 %v2244_v13 }
 0x1e1   :  { %2373 = vmatprep.subr.bf16.mxu1 %v2372_v36 }
 0x1e3   :  { %2247 = vmatpush1.bf16.msra.mxu0 %v2246_v52 }
 0x1e4   :  { %2375 = vmatpush1.bf16.msra.mxu1 %v2374_v51 }
 0x1e6   :  { %1663 = vmatmul.mubr.f32.vlgmr.msra.gmra.mrb[4].mxu0 %v3217_v18 }
 0x1e7   :  { %1817 = vmatmul.mubr.f32.vlgmr.msra.gmra.mrb[4].mxu1 %v3217_v18  ;;  %1668 = vmatprep.mubr.f32.mxu0 %v3245_v14  ;;  %v3533_v18 = vsub.s32 3, %v3529_v34 }
 0x1e8   :  { %1822 = vmatprep.mubr.f32.mxu1 %v3245_v14 }
 0x1e9   :  { %v1188_v17 = vrot.slane %v1171_v45, %v3533_v18 }
 0x1ea   :  { %1669 = vmatmul.mubr.f32.gmra.mrb[6].mxu0 %v3264_v25 }
 0x1eb   :  { %1823 = vmatmul.mubr.f32.gmra.mrb[6].mxu1 %v3264_v25 }
 0x237   :  { %v1356_v19 = vpop.f32.mrb[0].mxu0 }
 0x238   :  { %v1510_v57 = vpop.f32.mrb[0].mxu1  ;;  %v2376_v14 = vadd.f32 %v1356_v19, %v1176_v23  ;;  %v1358_v61 = vpop.f32.mrb[1].mxu0 }
 0x239   :  { %v2380_v60 = vadd.f32 %v1510_v57, %v1184_v35  ;;  %v1512_v5 = vpop.f32.mrb[1].mxu1  ;;  %v2377_v25 = vadd.f32 %v1358_v61, %v1180_v46 }
 0x23a   :  { %v2381_v0 = vadd.f32 %v1512_v5, %v1188_v17  ;;  %1829 = vst [vmem:[#allocation11] sm:$0xff] %v2376_v14 }
 0x23b   :  { %1831 = vst [vmem:[#allocation11 + $0x10] sm:$0xff] %v2380_v60  ;;  %1830 = vst [vmem:[#allocation11 + $0x8] sm:$0xff] %v2377_v25  ;;  %v1362_v4 = vpop.f32.mrb[2].mxu0 }
 0x23c   :  { %1832 = vst [vmem:[#allocation11 + $0x18] sm:$0xff] %v2381_v0  ;;  %v1516_v42 = vpop.f32.mrb[2].mxu1  ;;  %v2378_v29 = vadd.f32 %v1362_v4, %v1176_v23  ;;  %v1364_v15 = vpop.f32.mrb[3].mxu0 }
 0x23d   :  { %v2382_v48 = vadd.f32 %v1516_v42, %v1184_v35  ;;  %v1518_v3 = vpop.f32.mrb[3].mxu1  ;;  %v2379_v2 = vadd.f32 %v1364_v15, %v1180_v46 }
 0x23e   :  { %v2383_v32 = vadd.f32 %v1518_v3, %v1188_v17  ;;  %1837 = vst [vmem:[#allocation11 + $0x40] sm:$0xff] %v2378_v29 }
 0x23f   :  { %1839 = vst [vmem:[#allocation11 + $0x50] sm:$0xff] %v2382_v48  ;;  %1838 = vst [vmem:[#allocation11 + $0x48] sm:$0xff] %v2379_v2 }
 0x240   :  { %1840 = vst [vmem:[#allocation11 + $0x58] sm:$0xff] %v2383_v32 }
 0x2b9   :  { %v1664_v6 = vpop.f32.mrb[4].mxu0 }
 0x2ba   :  { %v2384_v55 = vadd.f32 %v1664_v6, %v1192_v10  ;;  %v1818_v1 = vpop.f32.mrb[4].mxu1  ;;  %v1666_v37 = vpop.f32.mrb[5].mxu0 }
 0x2bb   :  { %v2388_v30 = vadd.f32 %v1818_v1, %v1200_v62  ;;  %v2385_v59 = vadd.f32 %v1666_v37, %v1196_v38  ;;  %v1820_v50 = vpop.f32.mrb[5].mxu1 }
 0x2bc   :  { %1833 = vst [vmem:[#allocation11 + $0x20] sm:$0xff] %v2384_v55  ;;  %v2389_v49 = vadd.f32 %v1820_v50, %v1204_v63 }
 0x2bd   :  { %1835 = vst [vmem:[#allocation11 + $0x30] sm:$0xff] %v2388_v30  ;;  %1834 = vst [vmem:[#allocation11 + $0x28] sm:$0xff] %v2385_v59  ;;  %v1670_v26 = vpop.f32.mrb[6].mxu0 }
 0x2be   :  { %1836 = vst [vmem:[#allocation11 + $0x38] sm:$0xff] %v2389_v49  ;;  %v2386_v11 = vadd.f32 %v1670_v26, %v1192_v10  ;;  %v1824_v28 = vpop.f32.mrb[6].mxu1  ;;  %v1672_v22 = vpop.f32.mrb[7].mxu0 }
 0x2bf   :  { %v2390_v56 = vadd.f32 %v1824_v28, %v1200_v62  ;;  %v2387_v47 = vadd.f32 %v1672_v22, %v1196_v38  ;;  %v1826_v44 = vpop.f32.mrb[7].mxu1 }
 0x2c0   :  { %1841 = vst [vmem:[#allocation11 + $0x60] sm:$0xff] %v2386_v11  ;;  %v2391_v33 = vadd.f32 %v1826_v44, %v1204_v63 }
 0x2c1   :  { %1843 = vst [vmem:[#allocation11 + $0x70] sm:$0xff] %v2390_v56  ;;  %1842 = vst [vmem:[#allocation11 + $0x68] sm:$0xff] %v2387_v47 }
 0x2c2   :  { %1844 = vst [vmem:[#allocation11 + $0x78] sm:$0xff] %v2391_v33 }
 0x2c3   :  { %2539 = shalt.err (!%p2536_p2)
}
 0x2c4   :  { %s2540_s7 = scalar_lea.hbm %s3324_s5, 2048 }
 0x2c5   :  { %p2541_p3 = scmp.ne.s32.totalorder %s3324_s5, %s2540_s7  ;;  %p2544_p4 = scmp.lt.u32.totalorder %s2540_s7, %s3324_s5 }
 0x2c7   :  { %p2546_p5 = pnand %p2544_p4, %p2541_p3 }
 0x2c9   :  { %2549 = shalt.err (!%p2546_p5)
}
 0x2ca   :  { %1856 = dma.vmem_to_hbm [thread:$0]  %s1851_s21, 2048, %s3324_s5, [#allocation4], %s2560_s1, %s2560_s1, %s2561_s15  }
 0x2cb   :  { %2556 = dma.done.wait [#allocation4], 2048  }
 0x2cc   :  { %2557 = vsyncadd [#allocation4], 4294965248 }
 0x2cd   :  { %1860 = vsyncpa [#allocation3], 1 }
 0x2ce   :  { %1861 = vsyncpa [#allocation6], 1 }
 0x2cf   :  { %1862 = vsyncpa [#allocation9], 1 }
 0x2d0   :  { %1863 = vsyncpa [#allocation4], 1 }

</bundles_post_ra>
